<compile_context>
chip_gen: v6e
topology: v6e:2x2x1
jax: 0.10.0
libtpu: 0.0.40
codegen_flags: <defaults>
</compile_context>

<pallas_src>
import functools

import jax
import jax.numpy as jnp
from jax.experimental import pallas as pl
from jax.experimental.pallas import tpu as pltpu

MXU_DTYPE = jnp.bfloat16      # MXU operand dtype (accumulation is always f32)
WEIGHT_DTYPE = MXU_DTYPE      # conv weights stored pre-cast in HBM
BN_EPS = 1e-5


# ---------------------------------------------------------------------------
# In-kernel helpers
# ---------------------------------------------------------------------------
def _mm(w, x):
    """MXU matmul, bf16 operands, f32 accumulation."""
    return jnp.dot(w.astype(MXU_DTYPE), x.astype(MXU_DTYPE),
                   preferred_element_type=jnp.float32)


def _bn(y, gamma, beta, pos, L, inv_n):
    """Training-mode BatchNorm1d over the valid lanes (pos < L), single pass
    (sum + sum-of-squares), applied as one fused scale/shift."""
    valid = jnp.broadcast_to(pos, y.shape) < L
    ym = jnp.where(valid, y, 0.0)
    s1 = jnp.sum(ym, axis=1, keepdims=True)
    s2 = jnp.sum(ym * ym, axis=1, keepdims=True)
    mean = s1 * inv_n
    var = jnp.maximum(s2 * inv_n - mean * mean, 0.0)
    scale = gamma * jax.lax.rsqrt(var + BN_EPS)
    return y * scale + (beta - mean * scale)


def _conv_reflect(w, y, pos, L, K):
    """Stride-1, reflect-padded Conv1d as a tap-wise MXU accumulation.

    w   : (C_out, K*C_in) value; columns [k*C_in:(k+1)*C_in] hold torch_w[:, :, k].
    y   : (C_in, Np) f32, batch-major length-L segments along the lane axis.
    pos : (1, Np) int32, position within the length-L segment (== L for padded lanes).

    Each tap d uses a circularly rolled copy of y (pltpu.roll -> XLU slot, no scratch);
    the circular wrap only lands on per-batch edge / padded lanes, which the single-compare
    edge masks overwrite with the correct reflected columns (padded lanes are don't-care).
    """
    pad = (K - 1) // 2
    c_in, np_ = y.shape
    posb = jnp.broadcast_to(pos, y.shape)
    # rolled[m][:, j] == y[:, (j + m) % Np]
    rolled = {0: y}
    for m in range(1, pad + 1):
        rolled[m] = pltpu.roll(y, np_ - m, axis=1)
        rolled[-m] = pltpu.roll(y, m, axis=1)
    # edge masks: one compare each, hoisted out of the tap loop and shared across taps
    edge = {l: posb == l for l in list(range(pad)) + list(range(L - pad, L))}

    acc = None
    for k in range(K):
        d = k - pad
        t = rolled[d]
        for l in range(0, -d):              # left-edge reflection (tap reaches past pos 0)
            t = jnp.where(edge[l], rolled[-2 * l - d], t)
        for l in range(L - d, L):           # right-edge reflection (past pos L-1)
            t = jnp.where(edge[l], rolled[2 * (L - 1 - l) - d], t)
        part = _mm(w[:, k * c_in:(k + 1) * c_in], t)
        acc = part if acc is None else acc + part
    return acc


# ---------------------------------------------------------------------------
# Kernels
# ---------------------------------------------------------------------------
def _make_stem_head_kernel(n_parts, total, L, K, n_valid):
    """Fused: per-part (Conv1d k=1 + bias + BN) -> concat (folded into the k=1 'linear'
    conv as a sum of per-part weight slices) -> ReflectionPad1d + Conv1d(K) + BN + ReLU."""
    inv_n = 1.0 / float(n_valid)

    def kernel(*refs):
        pos = refs[0][...]
        o_ref = refs[-1]
        base = 1 + 6 * n_parts
        lin_b, in_w, in_g, in_be = (refs[base + j][...] for j in range(4))
        np_ = o_ref.shape[1]

        mid = jnp.zeros((total, np_), jnp.float32)
        for i in range(n_parts):
            x, w, b, g, be, lw = (refs[1 + 6 * i + j][...] for j in range(6))
            y = _mm(w, x) + b                       # Conv1d(k=1) + bias
            y = _bn(y, g, be, pos, L, inv_n)        # BatchNorm1d (batch stats)
            mid = mid + _mm(lw, y)                  # this part's slice of the 'linear' conv
        mid = mid + lin_b

        # head: ReflectionPad1d(3) + Conv1d(total, ngf, 7, bias=False) + BN + ReLU
        h = _conv_reflect(in_w, mid, pos, L, K)
        h = _bn(h, in_g, in_be, pos, L, inv_n)
        o_ref[...] = jnp.maximum(h, 0.0)
    return kernel


def _make_block_chain_kernel(L, n_valid):
    """ALL Resnet1dBlocks in one gridded kernel: h persists in the (constant-index) output
    VMEM block across grid iterations; per-block weights are streamed per iteration."""
    K = 3
    inv_n = 1.0 / float(n_valid)

    def kernel(pos_ref, h_ref, w1_ref, g1_ref, b1_ref, w2_ref, g2_ref, b2_ref, o_ref):
        @pl.when(pl.program_id(0) == 0)
        def _():
            o_ref[...] = h_ref[...]                 # load the residual carry once

        pos = pos_ref[...]
        h = o_ref[...]
        y1 = _conv_reflect(w1_ref[...], h, pos, L, K)
        y1 = jnp.maximum(_bn(y1, g1_ref[...], b1_ref[...], pos, L, inv_n), 0.0)
        # TODO(synk): use_dropout=False by default, so the Dropout(0.5) branch is omitted.
        y2 = _conv_reflect(w2_ref[...], y1, pos, L, K)
        y2 = _bn(y2, g2_ref[...], b2_ref[...], pos, L, inv_n)
        o_ref[...] = h + y2                         # residual add (f32 carry)
    return kernel


def _make_tail_kernel(L, K):
    """ReflectionPad1d(3) + Conv1d(K, bias=True) + Tanh."""
    def kernel(pos_ref, x_ref, w_ref, b_ref, o_ref):
        y = _conv_reflect(w_ref[...], x_ref[...], pos_ref[...], L, K) + b_ref[...]
        o_ref[...] = jnp.tanh(y)
    return kernel


# ---------------------------------------------------------------------------
# pallas_call wrappers
# ---------------------------------------------------------------------------
def _stem_head(xs, emb_params, lin_w, lin_b, in_w, in_g, in_be, pos, *, L, n_valid):
    n_parts = len(xs)
    total = lin_w.shape[0]
    ngf, np_ = in_w.shape[0], xs[0].shape[1]
    inputs, off = [pos], 0
    for x, ep in zip(xs, emb_params):
        co = ep["w"].shape[0]
        inputs += [x, ep["w"], ep["b"], ep["g"], ep["be"], lin_w[:, off:off + co]]
        off += co
    inputs += [lin_b, in_w, in_g, in_be]
    return pl.pallas_call(
        _make_stem_head_kernel(n_parts, total, L, 7, n_valid),
        out_shape=jax.ShapeDtypeStruct((ngf, np_), jnp.float32),
    )(*inputs)


def _block_chain(h, blocks, pos, *, L, n_valid):
    n_blocks = blocks["w1"].shape[0]
    c, np_ = h.shape
    kw = blocks["w1"].shape[2]
    wspec = pl.BlockSpec((None, c, kw), lambda i: (i, 0, 0))   # streamed per block
    vspec = pl.BlockSpec((None, c, 1), lambda i: (i, 0, 0))
    pos_spec = pl.BlockSpec((1, np_), lambda i: (0, 0))        # resident across iterations
    h_spec = pl.BlockSpec((c, np_), lambda i: (0, 0))
    return pl.pallas_call(
        _make_block_chain_kernel(L, n_valid),
        grid=(n_blocks,),
        in_specs=[pos_spec, h_spec, wspec, vspec, vspec, wspec, vspec, vspec],
        out_specs=pl.BlockSpec((c, np_), lambda i: (0, 0)),    # constant block -> VMEM carry
        out_shape=jax.ShapeDtypeStruct((c, np_), jnp.float32),
        compiler_params=pltpu.CompilerParams(dimension_semantics=("arbitrary",)),
    )(pos, h, blocks["w1"], blocks["g1"], blocks["b1"],
      blocks["w2"], blocks["g2"], blocks["b2"])


def _tail(x, w, b, pos, *, L):
    c_out, np_ = w.shape[0], x.shape[1]
    return pl.pallas_call(
        _make_tail_kernel(L, 7),
        out_shape=jax.ShapeDtypeStruct((c_out, np_), jnp.float32),
    )(pos, x, w, b)


# ---------------------------------------------------------------------------
# Parameter init (deterministic, synthetic — mirrors module __init__ shapes,
# conv weights stored flattened + bf16 as described above)
# ---------------------------------------------------------------------------
def init_params(key, input_nc, output_nc, ngf, n_blocks, svg_out):
    cnt = [0]

    def nk():
        cnt[0] += 1
        return jax.random.fold_in(key, cnt[0])

    def winit(shape, fan_in, dtype=WEIGHT_DTYPE):
        w = jax.random.normal(nk(), shape, jnp.float32) / jnp.sqrt(float(fan_in))
        return w.astype(dtype)

    total = sum(output_nc)
    p = {"emb": []}
    for ci, co in zip(input_nc, output_nc):
        p["emb"].append(dict(
            w=winit((co, ci), ci),                          # Conv1d(ci, co, k=1)
            b=winit((co, 1), ci, jnp.float32),
            g=jnp.ones((co, 1), jnp.float32),
            be=jnp.zeros((co, 1), jnp.float32)))
    p["lin_w"] = winit((total, total), total)               # Conv1d(total, total, k=1)
    p["lin_b"] = winit((total, 1), total, jnp.float32)
    p["in_w"] = winit((ngf, 7 * total), 7 * total)          # Conv1d(total, ngf, 7, bias=False)
    p["in_g"] = jnp.ones((ngf, 1), jnp.float32)
    p["in_be"] = jnp.zeros((ngf, 1), jnp.float32)
    # resnet blocks: stacked along a leading n_blocks axis, streamed by the gridded kernel
    p["blocks"] = dict(
        w1=winit((n_blocks, ngf, 3 * ngf), 3 * ngf),
        g1=jnp.ones((n_blocks, ngf, 1), jnp.float32),
        b1=jnp.zeros((n_blocks, ngf, 1), jnp.float32),
        w2=winit((n_blocks, ngf, 3 * ngf), 3 * ngf),
        g2=jnp.ones((n_blocks, ngf, 1), jnp.float32),
        b2=jnp.zeros((n_blocks, ngf, 1), jnp.float32))
    p["out_w"] = winit((svg_out, 7 * ngf), 7 * ngf)         # Conv1d(ngf, svg_out, 7, bias=True)
    p["out_b"] = winit((svg_out, 1), 7 * ngf, jnp.float32)
    return p


# ---------------------------------------------------------------------------
# Forward pass (SvgResnetGenerator.forward, need_mid=False, use_dropout=False)
# ---------------------------------------------------------------------------
def svg_resnet_forward(x, params, *, input_nc):
    B, c_in, L = x.shape
    assert L > 3, "reflection pad 3 needs L >= 4"
    N = B * L
    n_pad = max(128, ((N + 127) // 128) * 128)     # lane-dense multiple of 128

    # (B, C, L) -> channel-major (C, B*L), zero-padded along lanes  [layout glue, no kernels]
    x2 = jnp.transpose(x, (1, 0, 2)).reshape(c_in, N)
    x2 = jnp.pad(x2, ((0, 0), (0, n_pad - N)))
    # per-lane position within its length-L segment; padded lanes marked with L
    lane = jnp.arange(n_pad, dtype=jnp.int32)
    pos = jnp.where(lane < N, lane % L, L).reshape(1, n_pad).astype(jnp.int32)

    # torch.split(input, input_nc, dim=1)
    xs, off = [], 0
    for c in input_nc:
        xs.append(x2[off:off + c])
        off += c

    # 1) embeddings + concat + linear + resnet head, fully fused
    h = _stem_head(xs, params["emb"], params["lin_w"], params["lin_b"],
                   params["in_w"], params["in_g"], params["in_be"], pos,
                   L=L, n_valid=N)

    # 2) all Resnet1dBlocks in ONE gridded kernel (h never leaves VMEM between blocks)
    if params["blocks"]["w1"].shape[0] > 0:
        h = _block_chain(h, params["blocks"], pos, L=L, n_valid=N)

    # 3) tail: ReflectionPad1d(3) + Conv1d(7, bias=True) + Tanh
    out2 = _tail(h, params["out_w"], params["out_b"], pos, L=L)

    svg_out = out2.shape[0]
    out2 = out2[:, :N]                              # drop padded lanes
    return jnp.transpose(out2.reshape(svg_out, B, L), (1, 0, 2))   # back to (B, C, L)


if __name__ == "__main__":
    # small shapes consistent with the module
    input_nc = (3, 5)          # channel split sizes of the input
    output_nc = (4, 4)         # per-part embedding widths -> total_nc = 8
    B, L = 2, 16
    ngf = 32
    n_blocks = 2               # resnet_layer (12 by default; kept small here)
    svg_out = 3                # svgresnet_output

    key = jax.random.PRNGKey(0)
    kparam, kx = jax.random.split(key)
    params = init_params(kparam, input_nc, output_nc, ngf, n_blocks, svg_out)
    x = jax.random.normal(kx, (B, sum(input_nc), L), jnp.float32)

    fwd = jax.jit(functools.partial(svg_resnet_forward, input_nc=input_nc))
    out = jax.block_until_ready(fwd(x, params))

    assert out.shape == (B, svg_out, L), out.shape
    assert bool(jnp.all(jnp.isfinite(out)))
    assert bool(jnp.all(jnp.abs(out) <= 1.0))   # tanh output range
    print("KERNEL_OK")
</pallas_src>

<mosaic_0001>
module attributes {stable_mosaic.version = 11 : i64} {
  func.func @kernel(%arg0: memref<1x128xi32, #tpu.memory_space<vmem>>, %arg1: memref<32x128xf32, #tpu.memory_space<vmem>>, %arg2: memref<3x224xbf16, #tpu.memory_space<vmem>>, %arg3: memref<3x1xf32, #tpu.memory_space<vmem>>, %arg4: memref<3x128xf32, #tpu.memory_space<vmem>>) attributes {dimension_semantics = [], scalar_prefetch = 0 : i64, scratch_operands = 0 : i64, tpu.core_type = #tpu.core_type<tc>} {
    %c0 = arith.constant 0 : index
    %c0_0 = arith.constant 0 : index
    %0 = vector.load %arg2[%c0, %c0_0] : memref<3x224xbf16, #tpu.memory_space<vmem>>, vector<3x224xbf16>
    %c0_1 = arith.constant 0 : index
    %c0_2 = arith.constant 0 : index
    %1 = vector.load %arg1[%c0_1, %c0_2] : memref<32x128xf32, #tpu.memory_space<vmem>>, vector<32x128xf32>
    %c0_3 = arith.constant 0 : index
    %c0_4 = arith.constant 0 : index
    %2 = vector.load %arg0[%c0_3, %c0_4] : memref<1x128xi32, #tpu.memory_space<vmem>>, vector<1x128xi32>
    %3 = vector.shape_cast %2 : vector<1x128xi32> to vector<1x128xi32>
    %4 = vector.broadcast %3 : vector<1x128xi32> to vector<32x128xi32>
    %c127_i32 = arith.constant 127 : i32
    %5 = tpu.dynamic_rotate %1 by %c127_i32 dim 1 : vector<32x128xf32>, i32 -> vector<32x128xf32>
    %c1_i32 = arith.constant 1 : i32
    %6 = tpu.dynamic_rotate %1 by %c1_i32 dim 1 : vector<32x128xf32>, i32 -> vector<32x128xf32>
    %c126_i32 = arith.constant 126 : i32
    %7 = tpu.dynamic_rotate %1 by %c126_i32 dim 1 : vector<32x128xf32>, i32 -> vector<32x128xf32>
    %c2_i32 = arith.constant 2 : i32
    %8 = tpu.dynamic_rotate %1 by %c2_i32 dim 1 : vector<32x128xf32>, i32 -> vector<32x128xf32>
    %c125_i32 = arith.constant 125 : i32
    %9 = tpu.dynamic_rotate %1 by %c125_i32 dim 1 : vector<32x128xf32>, i32 -> vector<32x128xf32>
    %c3_i32 = arith.constant 3 : i32
    %10 = tpu.dynamic_rotate %1 by %c3_i32 dim 1 : vector<32x128xf32>, i32 -> vector<32x128xf32>
    %c0_i32 = arith.constant 0 : i32
    %11 = vector.broadcast %c0_i32 : i32 to vector<32x128xi32>
    %12 = arith.cmpi eq, %4, %11 : vector<32x128xi32>
    %c1_i32_5 = arith.constant 1 : i32
    %13 = vector.broadcast %c1_i32_5 : i32 to vector<32x128xi32>
    %14 = arith.cmpi eq, %4, %13 : vector<32x128xi32>
    %c2_i32_6 = arith.constant 2 : i32
    %15 = vector.broadcast %c2_i32_6 : i32 to vector<32x128xi32>
    %16 = arith.cmpi eq, %4, %15 : vector<32x128xi32>
    %c13_i32 = arith.constant 13 : i32
    %17 = vector.broadcast %c13_i32 : i32 to vector<32x128xi32>
    %18 = arith.cmpi eq, %4, %17 : vector<32x128xi32>
    %c14_i32 = arith.constant 14 : i32
    %19 = vector.broadcast %c14_i32 : i32 to vector<32x128xi32>
    %20 = arith.cmpi eq, %4, %19 : vector<32x128xi32>
    %c15_i32 = arith.constant 15 : i32
    %21 = vector.broadcast %c15_i32 : i32 to vector<32x128xi32>
    %22 = arith.cmpi eq, %4, %21 : vector<32x128xi32>
    %23 = arith.select %12, %9, %10 : vector<32x128xi1>, vector<32x128xf32>
    %24 = arith.select %14, %5, %23 : vector<32x128xi1>, vector<32x128xf32>
    %25 = arith.select %16, %6, %24 : vector<32x128xi1>, vector<32x128xf32>
    %26 = vector.extract_strided_slice %0 {offsets = [0, 0], sizes = [3, 32], strides = [1, 1]} : vector<3x224xbf16> to vector<3x32xbf16>
    %27 = arith.truncf %25 : vector<32x128xf32> to vector<32x128xbf16>
    %cst = arith.constant dense<0.000000e+00> : vector<3x128xf32>
    %28 = tpu.matmul %26, %27, %cst {dimension_numbers = #tpu.dot_dimension_numbers<[1], [0], [0], [1], [0, 0, 1, 1], [], []>} : vector<3x32xbf16>, vector<32x128xbf16>, vector<3x128xf32> -> vector<3x128xf32>
    %29 = arith.select %12, %7, %8 : vector<32x128xi1>, vector<32x128xf32>
    %30 = arith.select %14, %1, %29 : vector<32x128xi1>, vector<32x128xf32>
    %31 = vector.extract_strided_slice %0 {offsets = [0, 32], sizes = [3, 32], strides = [1, 1]} : vector<3x224xbf16> to vector<3x32xbf16>
    %32 = arith.truncf %30 : vector<32x128xf32> to vector<32x128xbf16>
    %cst_7 = arith.constant dense<0.000000e+00> : vector<3x128xf32>
    %33 = tpu.matmul %31, %32, %cst_7 {dimension_numbers = #tpu.dot_dimension_numbers<[1], [0], [0], [1], [0, 0, 1, 1], [], []>} : vector<3x32xbf16>, vector<32x128xbf16>, vector<3x128xf32> -> vector<3x128xf32>
    %34 = arith.addf %28, %33 : vector<3x128xf32>
    %35 = arith.select %12, %5, %6 : vector<32x128xi1>, vector<32x128xf32>
    %36 = vector.extract_strided_slice %0 {offsets = [0, 64], sizes = [3, 32], strides = [1, 1]} : vector<3x224xbf16> to vector<3x32xbf16>
    %37 = arith.truncf %35 : vector<32x128xf32> to vector<32x128xbf16>
    %cst_8 = arith.constant dense<0.000000e+00> : vector<3x128xf32>
    %38 = tpu.matmul %36, %37, %cst_8 {dimension_numbers = #tpu.dot_dimension_numbers<[1], [0], [0], [1], [0, 0, 1, 1], [], []>} : vector<3x32xbf16>, vector<32x128xbf16>, vector<3x128xf32> -> vector<3x128xf32>
    %39 = arith.addf %34, %38 : vector<3x128xf32>
    %40 = vector.extract_strided_slice %0 {offsets = [0, 96], sizes = [3, 32], strides = [1, 1]} : vector<3x224xbf16> to vector<3x32xbf16>
    %41 = arith.truncf %1 : vector<32x128xf32> to vector<32x128xbf16>
    %cst_9 = arith.constant dense<0.000000e+00> : vector<3x128xf32>
    %42 = tpu.matmul %40, %41, %cst_9 {dimension_numbers = #tpu.dot_dimension_numbers<[1], [0], [0], [1], [0, 0, 1, 1], [], []>} : vector<3x32xbf16>, vector<32x128xbf16>, vector<3x128xf32> -> vector<3x128xf32>
    %43 = arith.addf %39, %42 : vector<3x128xf32>
    %44 = arith.select %22, %6, %5 : vector<32x128xi1>, vector<32x128xf32>
    %45 = vector.extract_strided_slice %0 {offsets = [0, 128], sizes = [3, 32], strides = [1, 1]} : vector<3x224xbf16> to vector<3x32xbf16>
    %46 = arith.truncf %44 : vector<32x128xf32> to vector<32x128xbf16>
    %cst_10 = arith.constant dense<0.000000e+00> : vector<3x128xf32>
    %47 = tpu.matmul %45, %46, %cst_10 {dimension_numbers = #tpu.dot_dimension_numbers<[1], [0], [0], [1], [0, 0, 1, 1], [], []>} : vector<3x32xbf16>, vector<32x128xbf16>, vector<3x128xf32> -> vector<3x128xf32>
    %48 = arith.addf %43, %47 : vector<3x128xf32>
    %49 = arith.select %20, %1, %7 : vector<32x128xi1>, vector<32x128xf32>
    %50 = arith.select %22, %8, %49 : vector<32x128xi1>, vector<32x128xf32>
    %51 = vector.extract_strided_slice %0 {offsets = [0, 160], sizes = [3, 32], strides = [1, 1]} : vector<3x224xbf16> to vector<3x32xbf16>
    %52 = arith.truncf %50 : vector<32x128xf32> to vector<32x128xbf16>
    %cst_11 = arith.constant dense<0.000000e+00> : vector<3x128xf32>
    %53 = tpu.matmul %51, %52, %cst_11 {dimension_numbers = #tpu.dot_dimension_numbers<[1], [0], [0], [1], [0, 0, 1, 1], [], []>} : vector<3x32xbf16>, vector<32x128xbf16>, vector<3x128xf32> -> vector<3x128xf32>
    %54 = arith.addf %48, %53 : vector<3x128xf32>
    %55 = arith.select %18, %5, %9 : vector<32x128xi1>, vector<32x128xf32>
    %56 = arith.select %20, %6, %55 : vector<32x128xi1>, vector<32x128xf32>
    %57 = arith.select %22, %10, %56 : vector<32x128xi1>, vector<32x128xf32>
    %58 = vector.extract_strided_slice %0 {offsets = [0, 192], sizes = [3, 32], strides = [1, 1]} : vector<3x224xbf16> to vector<3x32xbf16>
    %59 = arith.truncf %57 : vector<32x128xf32> to vector<32x128xbf16>
    %cst_12 = arith.constant dense<0.000000e+00> : vector<3x128xf32>
    %60 = tpu.matmul %58, %59, %cst_12 {dimension_numbers = #tpu.dot_dimension_numbers<[1], [0], [0], [1], [0, 0, 1, 1], [], []>} : vector<3x32xbf16>, vector<32x128xbf16>, vector<3x128xf32> -> vector<3x128xf32>
    %61 = arith.addf %54, %60 : vector<3x128xf32>
    %c0_13 = arith.constant 0 : index
    %c0_14 = arith.constant 0 : index
    %62 = vector.load %arg3[%c0_13, %c0_14] : memref<3x1xf32, #tpu.memory_space<vmem>>, vector<3x1xf32>
    %63 = vector.broadcast %62 : vector<3x1xf32> to vector<3x128xf32>
    %64 = arith.addf %61, %63 : vector<3x128xf32>
    %65 = math.tanh %64 : vector<3x128xf32>
    %c0_15 = arith.constant 0 : index
    %c0_16 = arith.constant 0 : index
    %66 = vector.load %arg4[%c0_15, %c0_16] : memref<3x128xf32, #tpu.memory_space<vmem>>, vector<3x128xf32>
    tpu.vector_store %arg4[%c0_15, %c0_16], %65 {strides = array<i32>} : memref<3x128xf32, #tpu.memory_space<vmem>>, vector<3x128xf32>,
    return
  }
}

module attributes {stable_mosaic.version = 11 : i64} {
  func.func @kernel(%arg0: i32, %arg1: memref<1x128xi32, #tpu.memory_space<vmem>>, %arg2: memref<32x128xf32, #tpu.memory_space<vmem>>, %arg3: memref<1x32x96xbf16, #tpu.memory_space<vmem>>, %arg4: memref<1x32x1xf32, #tpu.memory_space<vmem>>, %arg5: memref<1x32x1xf32, #tpu.memory_space<vmem>>, %arg6: memref<1x32x96xbf16, #tpu.memory_space<vmem>>, %arg7: memref<1x32x1xf32, #tpu.memory_space<vmem>>, %arg8: memref<1x32x1xf32, #tpu.memory_space<vmem>>, %arg9: memref<32x128xf32, #tpu.memory_space<vmem>>) attributes {dimension_semantics = [#tpu.dimension_semantics<arbitrary>], iteration_bounds = array<i64: 2>, scalar_prefetch = 0 : i64, scratch_operands = 0 : i64, tpu.core_type = #tpu.core_type<tc>, window_params = [{pipeline_mode = #tpu.pipeline_mode<synchronous>, transform_indices = @transform_0, window_bounds = array<i64: 1, 128>}, {pipeline_mode = #tpu.pipeline_mode<synchronous>, transform_indices = @transform_1, window_bounds = array<i64: 32, 128>}, {transform_indices = @transform_2, window_bounds = array<i64: 1, 32, 96>}, {transform_indices = @transform_3, window_bounds = array<i64: 1, 32, 1>}, {transform_indices = @transform_4, window_bounds = array<i64: 1, 32, 1>}, {transform_indices = @transform_5, window_bounds = array<i64: 1, 32, 96>}, {transform_indices = @transform_6, window_bounds = array<i64: 1, 32, 1>}, {transform_indices = @transform_7, window_bounds = array<i64: 1, 32, 1>}, {pipeline_mode = #tpu.pipeline_mode<synchronous>, transform_indices = @transform_8, window_bounds = array<i64: 32, 128>}]} {
    %c0_i32 = arith.constant 0 : i32
    %0 = arith.cmpi eq, %arg0, %c0_i32 : i32
    %1 = arith.extui %0 : i1 to i32
    %c0_i32_0 = arith.constant 0 : i32
    %2 = arith.cmpi ne, %1, %c0_i32_0 : i32
    scf.if %2 {
      %c0_50 = arith.constant 0 : index
      %c0_51 = arith.constant 0 : index
      %121 = vector.load %arg2[%c0_50, %c0_51] : memref<32x128xf32, #tpu.memory_space<vmem>>, vector<32x128xf32>
      %c0_52 = arith.constant 0 : index
      %c0_53 = arith.constant 0 : index
      %122 = vector.load %arg9[%c0_52, %c0_53] : memref<32x128xf32, #tpu.memory_space<vmem>>, vector<32x128xf32>
      tpu.vector_store %arg9[%c0_52, %c0_53], %121 {strides = array<i32>} : memref<32x128xf32, #tpu.memory_space<vmem>>, vector<32x128xf32>,
    } else {
    }
    %c0 = arith.constant 0 : index
    %c0_1 = arith.constant 0 : index
    %3 = vector.load %arg1[%c0, %c0_1] : memref<1x128xi32, #tpu.memory_space<vmem>>, vector<1x128xi32>
    %c0_2 = arith.constant 0 : index
    %c0_3 = arith.constant 0 : index
    %4 = vector.load %arg9[%c0_2, %c0_3] : memref<32x128xf32, #tpu.memory_space<vmem>>, vector<32x128xf32>
    %c0_4 = arith.constant 0 : index
    %c0_5 = arith.constant 0 : index
    %c0_6 = arith.constant 0 : index
    %5 = vector.load %arg3[%c0_4, %c0_5, %c0_6] : memref<1x32x96xbf16, #tpu.memory_space<vmem>>, vector<1x32x96xbf16>
    %6 = vector.shape_cast %5 : vector<1x32x96xbf16> to vector<32x96xbf16>
    %7 = vector.shape_cast %3 : vector<1x128xi32> to vector<1x128xi32>
    %8 = vector.broadcast %7 : vector<1x128xi32> to vector<32x128xi32>
    %c127_i32 = arith.constant 127 : i32
    %9 = tpu.dynamic_rotate %4 by %c127_i32 dim 1 : vector<32x128xf32>, i32 -> vector<32x128xf32>
    %c1_i32 = arith.constant 1 : i32
    %10 = tpu.dynamic_rotate %4 by %c1_i32 dim 1 : vector<32x128xf32>, i32 -> vector<32x128xf32>
    %c0_i32_7 = arith.constant 0 : i32
    %11 = vector.broadcast %c0_i32_7 : i32 to vector<32x128xi32>
    %12 = arith.cmpi eq, %8, %11 : vector<32x128xi32>
    %c15_i32 = arith.constant 15 : i32
    %13 = vector.broadcast %c15_i32 : i32 to vector<32x128xi32>
    %14 = arith.cmpi eq, %8, %13 : vector<32x128xi32>
    %15 = arith.select %12, %9, %10 : vector<32x128xi1>, vector<32x128xf32>
    %16 = vector.extract_strided_slice %6 {offsets = [0, 0], sizes = [32, 32], strides = [1, 1]} : vector<32x96xbf16> to vector<32x32xbf16>
    %17 = arith.truncf %15 : vector<32x128xf32> to vector<32x128xbf16>
    %cst = arith.constant dense<0.000000e+00> : vector<32x128xf32>
    %18 = tpu.matmul %16, %17, %cst {dimension_numbers = #tpu.dot_dimension_numbers<[1], [0], [0], [1], [0, 0, 1, 1], [], []>} : vector<32x32xbf16>, vector<32x128xbf16>, vector<32x128xf32> -> vector<32x128xf32>
    %19 = vector.extract_strided_slice %6 {offsets = [0, 32], sizes = [32, 32], strides = [1, 1]} : vector<32x96xbf16> to vector<32x32xbf16>
    %20 = arith.truncf %4 : vector<32x128xf32> to vector<32x128xbf16>
    %cst_8 = arith.constant dense<0.000000e+00> : vector<32x128xf32>
    %21 = tpu.matmul %19, %20, %cst_8 {dimension_numbers = #tpu.dot_dimension_numbers<[1], [0], [0], [1], [0, 0, 1, 1], [], []>} : vector<32x32xbf16>, vector<32x128xbf16>, vector<32x128xf32> -> vector<32x128xf32>
    %22 = arith.addf %18, %21 : vector<32x128xf32>
    %23 = arith.select %14, %10, %9 : vector<32x128xi1>, vector<32x128xf32>
    %24 = vector.extract_strided_slice %6 {offsets = [0, 64], sizes = [32, 32], strides = [1, 1]} : vector<32x96xbf16> to vector<32x32xbf16>
    %25 = arith.truncf %23 : vector<32x128xf32> to vector<32x128xbf16>
    %cst_9 = arith.constant dense<0.000000e+00> : vector<32x128xf32>
    %26 = tpu.matmul %24, %25, %cst_9 {dimension_numbers = #tpu.dot_dimension_numbers<[1], [0], [0], [1], [0, 0, 1, 1], [], []>} : vector<32x32xbf16>, vector<32x128xbf16>, vector<32x128xf32> -> vector<32x128xf32>
    %27 = arith.addf %22, %26 : vector<32x128xf32>
    %c0_10 = arith.constant 0 : index
    %c0_11 = arith.constant 0 : index
    %c0_12 = arith.constant 0 : index
    %28 = vector.load %arg4[%c0_10, %c0_11, %c0_12] : memref<1x32x1xf32, #tpu.memory_space<vmem>>, vector<1x32x1xf32>
    %29 = vector.shape_cast %28 : vector<1x32x1xf32> to vector<32x1xf32>
    %c0_13 = arith.constant 0 : index
    %c0_14 = arith.constant 0 : index
    %c0_15 = arith.constant 0 : index
    %30 = vector.load %arg5[%c0_13, %c0_14, %c0_15] : memref<1x32x1xf32, #tpu.memory_space<vmem>>, vector<1x32x1xf32>
    %31 = vector.shape_cast %30 : vector<1x32x1xf32> to vector<32x1xf32>
    %32 = vector.shape_cast %3 : vector<1x128xi32> to vector<1x128xi32>
    %33 = vector.broadcast %32 : vector<1x128xi32> to vector<32x128xi32>
    %c16_i32 = arith.constant 16 : i32
    %34 = vector.broadcast %c16_i32 : i32 to vector<32x128xi32>
    %35 = arith.cmpi slt, %33, %34 : vector<32x128xi32>
    %cst_16 = arith.constant 0.000000e+00 : f32
    %36 = vector.broadcast %cst_16 : f32 to vector<32x128xf32>
    %37 = arith.select %35, %27, %36 : vector<32x128xi1>, vector<32x128xf32>
    %cst_17 = arith.constant dense<0.000000e+00> : vector<32xf32>
    %38 = vector.multi_reduction <add>, %37, %cst_17 [1] : vector<32x128xf32> to vector<32xf32>
    %39 = vector.shape_cast %38 : vector<32xf32> to vector<32x1xf32>
    %40 = arith.mulf %37, %37 : vector<32x128xf32>
    %cst_18 = arith.constant dense<0.000000e+00> : vector<32xf32>
    %41 = vector.multi_reduction <add>, %40, %cst_18 [1] : vector<32x128xf32> to vector<32xf32>
    %42 = vector.shape_cast %41 : vector<32xf32> to vector<32x1xf32>
    %cst_19 = arith.constant 3.125000e-02 : f32
    %43 = vector.broadcast %cst_19 : f32 to vector<32x1xf32>
    %44 = arith.mulf %39, %43 : vector<32x1xf32>
    %cst_20 = arith.constant 3.125000e-02 : f32
    %45 = vector.broadcast %cst_20 : f32 to vector<32x1xf32>
    %46 = arith.mulf %42, %45 : vector<32x1xf32>
    %47 = arith.mulf %44, %44 : vector<32x1xf32>
    %48 = arith.subf %46, %47 : vector<32x1xf32>
    %cst_21 = arith.constant 0.000000e+00 : f32
    %49 = vector.broadcast %cst_21 : f32 to vector<32x1xf32>
    %50 = arith.maximumf %48, %49 : vector<32x1xf32>
    %cst_22 = arith.constant 9.99999974E-6 : f32
    %51 = vector.broadcast %cst_22 : f32 to vector<32x1xf32>
    %52 = arith.addf %50, %51 : vector<32x1xf32>
    %53 = math.rsqrt %52 : vector<32x1xf32>
    %54 = arith.mulf %29, %53 : vector<32x1xf32>
    %55 = vector.broadcast %54 : vector<32x1xf32> to vector<32x128xf32>
    %56 = arith.mulf %27, %55 : vector<32x128xf32>
    %57 = arith.mulf %44, %54 : vector<32x1xf32>
    %58 = arith.subf %31, %57 : vector<32x1xf32>
    %59 = vector.broadcast %58 : vector<32x1xf32> to vector<32x128xf32>
    %60 = arith.addf %56, %59 : vector<32x128xf32>
    %cst_23 = arith.constant 0.000000e+00 : f32
    %61 = vector.broadcast %cst_23 : f32 to vector<32x128xf32>
    %62 = arith.maximumf %60, %61 : vector<32x128xf32>
    %c0_24 = arith.constant 0 : index
    %c0_25 = arith.constant 0 : index
    %c0_26 = arith.constant 0 : index
    %63 = vector.load %arg6[%c0_24, %c0_25, %c0_26] : memref<1x32x96xbf16, #tpu.memory_space<vmem>>, vector<1x32x96xbf16>
    %64 = vector.shape_cast %63 : vector<1x32x96xbf16> to vector<32x96xbf16>
    %65 = vector.shape_cast %3 : vector<1x128xi32> to vector<1x128xi32>
    %66 = vector.broadcast %65 : vector<1x128xi32> to vector<32x128xi32>
    %c127_i32_27 = arith.constant 127 : i32
    %67 = tpu.dynamic_rotate %62 by %c127_i32_27 dim 1 : vector<32x128xf32>, i32 -> vector<32x128xf32>
    %c1_i32_28 = arith.constant 1 : i32
    %68 = tpu.dynamic_rotate %62 by %c1_i32_28 dim 1 : vector<32x128xf32>, i32 -> vector<32x128xf32>
    %c0_i32_29 = arith.constant 0 : i32
    %69 = vector.broadcast %c0_i32_29 : i32 to vector<32x128xi32>
    %70 = arith.cmpi eq, %66, %69 : vector<32x128xi32>
    %c15_i32_30 = arith.constant 15 : i32
    %71 = vector.broadcast %c15_i32_30 : i32 to vector<32x128xi32>
    %72 = arith.cmpi eq, %66, %71 : vector<32x128xi32>
    %73 = arith.select %70, %67, %68 : vector<32x128xi1>, vector<32x128xf32>
    %74 = vector.extract_strided_slice %64 {offsets = [0, 0], sizes = [32, 32], strides = [1, 1]} : vector<32x96xbf16> to vector<32x32xbf16>
    %75 = arith.truncf %73 : vector<32x128xf32> to vector<32x128xbf16>
    %cst_31 = arith.constant dense<0.000000e+00> : vector<32x128xf32>
    %76 = tpu.matmul %74, %75, %cst_31 {dimension_numbers = #tpu.dot_dimension_numbers<[1], [0], [0], [1], [0, 0, 1, 1], [], []>} : vector<32x32xbf16>, vector<32x128xbf16>, vector<32x128xf32> -> vector<32x128xf32>
    %77 = vector.extract_strided_slice %64 {offsets = [0, 32], sizes = [32, 32], strides = [1, 1]} : vector<32x96xbf16> to vector<32x32xbf16>
    %78 = arith.truncf %62 : vector<32x128xf32> to vector<32x128xbf16>
    %cst_32 = arith.constant dense<0.000000e+00> : vector<32x128xf32>
    %79 = tpu.matmul %77, %78, %cst_32 {dimension_numbers = #tpu.dot_dimension_numbers<[1], [0], [0], [1], [0, 0, 1, 1], [], []>} : vector<32x32xbf16>, vector<32x128xbf16>, vector<32x128xf32> -> vector<32x128xf32>
    %80 = arith.addf %76, %79 : vector<32x128xf32>
    %81 = arith.select %72, %68, %67 : vector<32x128xi1>, vector<32x128xf32>
    %82 = vector.extract_strided_slice %64 {offsets = [0, 64], sizes = [32, 32], strides = [1, 1]} : vector<32x96xbf16> to vector<32x32xbf16>
    %83 = arith.truncf %81 : vector<32x128xf32> to vector<32x128xbf16>
    %cst_33 = arith.constant dense<0.000000e+00> : vector<32x128xf32>
    %84 = tpu.matmul %82, %83, %cst_33 {dimension_numbers = #tpu.dot_dimension_numbers<[1], [0], [0], [1], [0, 0, 1, 1], [], []>} : vector<32x32xbf16>, vector<32x128xbf16>, vector<32x128xf32> -> vector<32x128xf32>
    %85 = arith.addf %80, %84 : vector<32x128xf32>
    %c0_34 = arith.constant 0 : index
    %c0_35 = arith.constant 0 : index
    %c0_36 = arith.constant 0 : index
    %86 = vector.load %arg7[%c0_34, %c0_35, %c0_36] : memref<1x32x1xf32, #tpu.memory_space<vmem>>, vector<1x32x1xf32>
    %87 = vector.shape_cast %86 : vector<1x32x1xf32> to vector<32x1xf32>
    %c0_37 = arith.constant 0 : index
    %c0_38 = arith.constant 0 : index
    %c0_39 = arith.constant 0 : index
    %88 = vector.load %arg8[%c0_37, %c0_38, %c0_39] : memref<1x32x1xf32, #tpu.memory_space<vmem>>, vector<1x32x1xf32>
    %89 = vector.shape_cast %88 : vector<1x32x1xf32> to vector<32x1xf32>
    %90 = vector.shape_cast %3 : vector<1x128xi32> to vector<1x128xi32>
    %91 = vector.broadcast %90 : vector<1x128xi32> to vector<32x128xi32>
    %c16_i32_40 = arith.constant 16 : i32
    %92 = vector.broadcast %c16_i32_40 : i32 to vector<32x128xi32>
    %93 = arith.cmpi slt, %91, %92 : vector<32x128xi32>
    %cst_41 = arith.constant 0.000000e+00 : f32
    %94 = vector.broadcast %cst_41 : f32 to vector<32x128xf32>
    %95 = arith.select %93, %85, %94 : vector<32x128xi1>, vector<32x128xf32>
    %cst_42 = arith.constant dense<0.000000e+00> : vector<32xf32>
    %96 = vector.multi_reduction <add>, %95, %cst_42 [1] : vector<32x128xf32> to vector<32xf32>
    %97 = vector.shape_cast %96 : vector<32xf32> to vector<32x1xf32>
    %98 = arith.mulf %95, %95 : vector<32x128xf32>
    %cst_43 = arith.constant dense<0.000000e+00> : vector<32xf32>
    %99 = vector.multi_reduction <add>, %98, %cst_43 [1] : vector<32x128xf32> to vector<32xf32>
    %100 = vector.shape_cast %99 : vector<32xf32> to vector<32x1xf32>
    %cst_44 = arith.constant 3.125000e-02 : f32
    %101 = vector.broadcast %cst_44 : f32 to vector<32x1xf32>
    %102 = arith.mulf %97, %101 : vector<32x1xf32>
    %cst_45 = arith.constant 3.125000e-02 : f32
    %103 = vector.broadcast %cst_45 : f32 to vector<32x1xf32>
    %104 = arith.mulf %100, %103 : vector<32x1xf32>
    %105 = arith.mulf %102, %102 : vector<32x1xf32>
    %106 = arith.subf %104, %105 : vector<32x1xf32>
    %cst_46 = arith.constant 0.000000e+00 : f32
    %107 = vector.broadcast %cst_46 : f32 to vector<32x1xf32>
    %108 = arith.maximumf %106, %107 : vector<32x1xf32>
    %cst_47 = arith.constant 9.99999974E-6 : f32
    %109 = vector.broadcast %cst_47 : f32 to vector<32x1xf32>
    %110 = arith.addf %108, %109 : vector<32x1xf32>
    %111 = math.rsqrt %110 : vector<32x1xf32>
    %112 = arith.mulf %87, %111 : vector<32x1xf32>
    %113 = vector.broadcast %112 : vector<32x1xf32> to vector<32x128xf32>
    %114 = arith.mulf %85, %113 : vector<32x128xf32>
    %115 = arith.mulf %102, %112 : vector<32x1xf32>
    %116 = arith.subf %89, %115 : vector<32x1xf32>
    %117 = vector.broadcast %116 : vector<32x1xf32> to vector<32x128xf32>
    %118 = arith.addf %114, %117 : vector<32x128xf32>
    %119 = arith.addf %4, %118 : vector<32x128xf32>
    %c0_48 = arith.constant 0 : index
    %c0_49 = arith.constant 0 : index
    %120 = vector.load %arg9[%c0_48, %c0_49] : memref<32x128xf32, #tpu.memory_space<vmem>>, vector<32x128xf32>
    tpu.vector_store %arg9[%c0_48, %c0_49], %119 {strides = array<i32>} : memref<32x128xf32, #tpu.memory_space<vmem>>, vector<32x128xf32>,
    return
  }
  func.func @transform_0(%arg0: i32) -> (i32, i32) {
    %c0_i32 = arith.constant 0 : i32
    %c0_i32_0 = arith.constant 0 : i32
    %c0_i32_1 = arith.constant 0 : i32
    return %c0_i32, %c0_i32_0 : i32, i32
  }
  func.func @transform_1(%arg0: i32) -> (i32, i32) {
    %c0_i32 = arith.constant 0 : i32
    %c0_i32_0 = arith.constant 0 : i32
    %c0_i32_1 = arith.constant 0 : i32
    return %c0_i32, %c0_i32_0 : i32, i32
  }
  func.func @transform_2(%arg0: i32) -> (i32, i32, i32) {
    %c0_i32 = arith.constant 0 : i32
    %c0_i32_0 = arith.constant 0 : i32
    %c0_i32_1 = arith.constant 0 : i32
    return %arg0, %c0_i32, %c0_i32_0 : i32, i32, i32
  }
  func.func @transform_3(%arg0: i32) -> (i32, i32, i32) {
    %c0_i32 = arith.constant 0 : i32
    %c0_i32_0 = arith.constant 0 : i32
    %c0_i32_1 = arith.constant 0 : i32
    return %arg0, %c0_i32, %c0_i32_0 : i32, i32, i32
  }
  func.func @transform_4(%arg0: i32) -> (i32, i32, i32) {
    %c0_i32 = arith.constant 0 : i32
    %c0_i32_0 = arith.constant 0 : i32
    %c0_i32_1 = arith.constant 0 : i32
    return %arg0, %c0_i32, %c0_i32_0 : i32, i32, i32
  }
  func.func @transform_5(%arg0: i32) -> (i32, i32, i32) {
    %c0_i32 = arith.constant 0 : i32
    %c0_i32_0 = arith.constant 0 : i32
    %c0_i32_1 = arith.constant 0 : i32
    return %arg0, %c0_i32, %c0_i32_0 : i32, i32, i32
  }
  func.func @transform_6(%arg0: i32) -> (i32, i32, i32) {
    %c0_i32 = arith.constant 0 : i32
    %c0_i32_0 = arith.constant 0 : i32
    %c0_i32_1 = arith.constant 0 : i32
    return %arg0, %c0_i32, %c0_i32_0 : i32, i32, i32
  }
  func.func @transform_7(%arg0: i32) -> (i32, i32, i32) {
    %c0_i32 = arith.constant 0 : i32
    %c0_i32_0 = arith.constant 0 : i32
    %c0_i32_1 = arith.constant 0 : i32
    return %arg0, %c0_i32, %c0_i32_0 : i32, i32, i32
  }
  func.func @transform_8(%arg0: i32) -> (i32, i32) {
    %c0_i32 = arith.constant 0 : i32
    %c0_i32_0 = arith.constant 0 : i32
    %c0_i32_1 = arith.constant 0 : i32
    return %c0_i32, %c0_i32_0 : i32, i32
  }
}

module attributes {stable_mosaic.version = 11 : i64} {
  func.func @kernel(%arg0: memref<1x128xi32, #tpu.memory_space<vmem>>, %arg1: memref<3x128xf32, #tpu.memory_space<vmem>>, %arg2: memref<4x3xbf16, #tpu.memory_space<vmem>>, %arg3: memref<4x1xf32, #tpu.memory_space<vmem>>, %arg4: memref<4x1xf32, #tpu.memory_space<vmem>>, %arg5: memref<4x1xf32, #tpu.memory_space<vmem>>, %arg6: memref<8x4xbf16, #tpu.memory_space<vmem>>, %arg7: memref<5x128xf32, #tpu.memory_space<vmem>>, %arg8: memref<4x5xbf16, #tpu.memory_space<vmem>>, %arg9: memref<4x1xf32, #tpu.memory_space<vmem>>, %arg10: memref<4x1xf32, #tpu.memory_space<vmem>>, %arg11: memref<4x1xf32, #tpu.memory_space<vmem>>, %arg12: memref<8x4xbf16, #tpu.memory_space<vmem>>, %arg13: memref<8x1xf32, #tpu.memory_space<vmem>>, %arg14: memref<32x56xbf16, #tpu.memory_space<vmem>>, %arg15: memref<32x1xf32, #tpu.memory_space<vmem>>, %arg16: memref<32x1xf32, #tpu.memory_space<vmem>>, %arg17: memref<32x128xf32, #tpu.memory_space<vmem>>) attributes {dimension_semantics = [], scalar_prefetch = 0 : i64, scratch_operands = 0 : i64, tpu.core_type = #tpu.core_type<tc>} {
    %c0 = arith.constant 0 : index
    %c0_0 = arith.constant 0 : index
    %0 = vector.load %arg0[%c0, %c0_0] : memref<1x128xi32, #tpu.memory_space<vmem>>, vector<1x128xi32>
    %c0_1 = arith.constant 0 : index
    %c0_2 = arith.constant 0 : index
    %1 = vector.load %arg13[%c0_1, %c0_2] : memref<8x1xf32, #tpu.memory_space<vmem>>, vector<8x1xf32>
    %c0_3 = arith.constant 0 : index
    %c0_4 = arith.constant 0 : index
    %2 = vector.load %arg14[%c0_3, %c0_4] : memref<32x56xbf16, #tpu.memory_space<vmem>>, vector<32x56xbf16>
    %c0_5 = arith.constant 0 : index
    %c0_6 = arith.constant 0 : index
    %3 = vector.load %arg15[%c0_5, %c0_6] : memref<32x1xf32, #tpu.memory_space<vmem>>, vector<32x1xf32>
    %c0_7 = arith.constant 0 : index
    %c0_8 = arith.constant 0 : index
    %4 = vector.load %arg16[%c0_7, %c0_8] : memref<32x1xf32, #tpu.memory_space<vmem>>, vector<32x1xf32>
    %cst = arith.constant 0.000000e+00 : f32
    %5 = vector.broadcast %cst : f32 to vector<8x128xf32>
    %c0_9 = arith.constant 0 : index
    %c0_10 = arith.constant 0 : index
    %6 = vector.load %arg1[%c0_9, %c0_10] : memref<3x128xf32, #tpu.memory_space<vmem>>, vector<3x128xf32>
    %c0_11 = arith.constant 0 : index
    %c0_12 = arith.constant 0 : index
    %7 = vector.load %arg2[%c0_11, %c0_12] : memref<4x3xbf16, #tpu.memory_space<vmem>>, vector<4x3xbf16>
    %c0_13 = arith.constant 0 : index
    %c0_14 = arith.constant 0 : index
    %8 = vector.load %arg3[%c0_13, %c0_14] : memref<4x1xf32, #tpu.memory_space<vmem>>, vector<4x1xf32>
    %c0_15 = arith.constant 0 : index
    %c0_16 = arith.constant 0 : index
    %9 = vector.load %arg4[%c0_15, %c0_16] : memref<4x1xf32, #tpu.memory_space<vmem>>, vector<4x1xf32>
    %c0_17 = arith.constant 0 : index
    %c0_18 = arith.constant 0 : index
    %10 = vector.load %arg5[%c0_17, %c0_18] : memref<4x1xf32, #tpu.memory_space<vmem>>, vector<4x1xf32>
    %c0_19 = arith.constant 0 : index
    %c0_20 = arith.constant 0 : index
    %11 = vector.load %arg6[%c0_19, %c0_20] : memref<8x4xbf16, #tpu.memory_space<vmem>>, vector<8x4xbf16>
    %12 = arith.truncf %6 : vector<3x128xf32> to vector<3x128xbf16>
    %cst_21 = arith.constant dense<0.000000e+00> : vector<4x128xf32>
    %13 = tpu.matmul %7, %12, %cst_21 {dimension_numbers = #tpu.dot_dimension_numbers<[1], [0], [0], [1], [0, 0, 1, 1], [], []>} : vector<4x3xbf16>, vector<3x128xbf16>, vector<4x128xf32> -> vector<4x128xf32>
    %14 = vector.broadcast %8 : vector<4x1xf32> to vector<4x128xf32>
    %15 = arith.addf %13, %14 : vector<4x128xf32>
    %16 = vector.shape_cast %0 : vector<1x128xi32> to vector<1x128xi32>
    %17 = vector.broadcast %16 : vector<1x128xi32> to vector<4x128xi32>
    %c16_i32 = arith.constant 16 : i32
    %18 = vector.broadcast %c16_i32 : i32 to vector<4x128xi32>
    %19 = arith.cmpi slt, %17, %18 : vector<4x128xi32>
    %cst_22 = arith.constant 0.000000e+00 : f32
    %20 = vector.broadcast %cst_22 : f32 to vector<4x128xf32>
    %21 = arith.select %19, %15, %20 : vector<4x128xi1>, vector<4x128xf32>
    %cst_23 = arith.constant dense<0.000000e+00> : vector<4xf32>
    %22 = vector.multi_reduction <add>, %21, %cst_23 [1] : vector<4x128xf32> to vector<4xf32>
    %23 = vector.shape_cast %22 : vector<4xf32> to vector<4x1xf32>
    %24 = arith.mulf %21, %21 : vector<4x128xf32>
    %cst_24 = arith.constant dense<0.000000e+00> : vector<4xf32>
    %25 = vector.multi_reduction <add>, %24, %cst_24 [1] : vector<4x128xf32> to vector<4xf32>
    %26 = vector.shape_cast %25 : vector<4xf32> to vector<4x1xf32>
    %cst_25 = arith.constant 3.125000e-02 : f32
    %27 = vector.broadcast %cst_25 : f32 to vector<4x1xf32>
    %28 = arith.mulf %23, %27 : vector<4x1xf32>
    %cst_26 = arith.constant 3.125000e-02 : f32
    %29 = vector.broadcast %cst_26 : f32 to vector<4x1xf32>
    %30 = arith.mulf %26, %29 : vector<4x1xf32>
    %31 = arith.mulf %28, %28 : vector<4x1xf32>
    %32 = arith.subf %30, %31 : vector<4x1xf32>
    %cst_27 = arith.constant 0.000000e+00 : f32
    %33 = vector.broadcast %cst_27 : f32 to vector<4x1xf32>
    %34 = arith.maximumf %32, %33 : vector<4x1xf32>
    %cst_28 = arith.constant 9.99999974E-6 : f32
    %35 = vector.broadcast %cst_28 : f32 to vector<4x1xf32>
    %36 = arith.addf %34, %35 : vector<4x1xf32>
    %37 = math.rsqrt %36 : vector<4x1xf32>
    %38 = arith.mulf %9, %37 : vector<4x1xf32>
    %39 = vector.broadcast %38 : vector<4x1xf32> to vector<4x128xf32>
    %40 = arith.mulf %15, %39 : vector<4x128xf32>
    %41 = arith.mulf %28, %38 : vector<4x1xf32>
    %42 = arith.subf %10, %41 : vector<4x1xf32>
    %43 = vector.broadcast %42 : vector<4x1xf32> to vector<4x128xf32>
    %44 = arith.addf %40, %43 : vector<4x128xf32>
    %45 = arith.truncf %44 : vector<4x128xf32> to vector<4x128xbf16>
    %cst_29 = arith.constant dense<0.000000e+00> : vector<8x128xf32>
    %46 = tpu.matmul %11, %45, %cst_29 {dimension_numbers = #tpu.dot_dimension_numbers<[1], [0], [0], [1], [0, 0, 1, 1], [], []>} : vector<8x4xbf16>, vector<4x128xbf16>, vector<8x128xf32> -> vector<8x128xf32>
    %47 = arith.addf %5, %46 : vector<8x128xf32>
    %c0_30 = arith.constant 0 : index
    %c0_31 = arith.constant 0 : index
    %48 = vector.load %arg7[%c0_30, %c0_31] : memref<5x128xf32, #tpu.memory_space<vmem>>, vector<5x128xf32>
    %c0_32 = arith.constant 0 : index
    %c0_33 = arith.constant 0 : index
    %49 = vector.load %arg8[%c0_32, %c0_33] : memref<4x5xbf16, #tpu.memory_space<vmem>>, vector<4x5xbf16>
    %c0_34 = arith.constant 0 : index
    %c0_35 = arith.constant 0 : index
    %50 = vector.load %arg9[%c0_34, %c0_35] : memref<4x1xf32, #tpu.memory_space<vmem>>, vector<4x1xf32>
    %c0_36 = arith.constant 0 : index
    %c0_37 = arith.constant 0 : index
    %51 = vector.load %arg10[%c0_36, %c0_37] : memref<4x1xf32, #tpu.memory_space<vmem>>, vector<4x1xf32>
    %c0_38 = arith.constant 0 : index
    %c0_39 = arith.constant 0 : index
    %52 = vector.load %arg11[%c0_38, %c0_39] : memref<4x1xf32, #tpu.memory_space<vmem>>, vector<4x1xf32>
    %c0_40 = arith.constant 0 : index
    %c0_41 = arith.constant 0 : index
    %53 = vector.load %arg12[%c0_40, %c0_41] : memref<8x4xbf16, #tpu.memory_space<vmem>>, vector<8x4xbf16>
    %54 = arith.truncf %48 : vector<5x128xf32> to vector<5x128xbf16>
    %cst_42 = arith.constant dense<0.000000e+00> : vector<4x128xf32>
    %55 = tpu.matmul %49, %54, %cst_42 {dimension_numbers = #tpu.dot_dimension_numbers<[1], [0], [0], [1], [0, 0, 1, 1], [], []>} : vector<4x5xbf16>, vector<5x128xbf16>, vector<4x128xf32> -> vector<4x128xf32>
    %56 = vector.broadcast %50 : vector<4x1xf32> to vector<4x128xf32>
    %57 = arith.addf %55, %56 : vector<4x128xf32>
    %58 = vector.shape_cast %0 : vector<1x128xi32> to vector<1x128xi32>
    %59 = vector.broadcast %58 : vector<1x128xi32> to vector<4x128xi32>
    %c16_i32_43 = arith.constant 16 : i32
    %60 = vector.broadcast %c16_i32_43 : i32 to vector<4x128xi32>
    %61 = arith.cmpi slt, %59, %60 : vector<4x128xi32>
    %cst_44 = arith.constant 0.000000e+00 : f32
    %62 = vector.broadcast %cst_44 : f32 to vector<4x128xf32>
    %63 = arith.select %61, %57, %62 : vector<4x128xi1>, vector<4x128xf32>
    %cst_45 = arith.constant dense<0.000000e+00> : vector<4xf32>
    %64 = vector.multi_reduction <add>, %63, %cst_45 [1] : vector<4x128xf32> to vector<4xf32>
    %65 = vector.shape_cast %64 : vector<4xf32> to vector<4x1xf32>
    %66 = arith.mulf %63, %63 : vector<4x128xf32>
    %cst_46 = arith.constant dense<0.000000e+00> : vector<4xf32>
    %67 = vector.multi_reduction <add>, %66, %cst_46 [1] : vector<4x128xf32> to vector<4xf32>
    %68 = vector.shape_cast %67 : vector<4xf32> to vector<4x1xf32>
    %cst_47 = arith.constant 3.125000e-02 : f32
    %69 = vector.broadcast %cst_47 : f32 to vector<4x1xf32>
    %70 = arith.mulf %65, %69 : vector<4x1xf32>
    %cst_48 = arith.constant 3.125000e-02 : f32
    %71 = vector.broadcast %cst_48 : f32 to vector<4x1xf32>
    %72 = arith.mulf %68, %71 : vector<4x1xf32>
    %73 = arith.mulf %70, %70 : vector<4x1xf32>
    %74 = arith.subf %72, %73 : vector<4x1xf32>
    %cst_49 = arith.constant 0.000000e+00 : f32
    %75 = vector.broadcast %cst_49 : f32 to vector<4x1xf32>
    %76 = arith.maximumf %74, %75 : vector<4x1xf32>
    %cst_50 = arith.constant 9.99999974E-6 : f32
    %77 = vector.broadcast %cst_50 : f32 to vector<4x1xf32>
    %78 = arith.addf %76, %77 : vector<4x1xf32>
    %79 = math.rsqrt %78 : vector<4x1xf32>
    %80 = arith.mulf %51, %79 : vector<4x1xf32>
    %81 = vector.broadcast %80 : vector<4x1xf32> to vector<4x128xf32>
    %82 = arith.mulf %57, %81 : vector<4x128xf32>
    %83 = arith.mulf %70, %80 : vector<4x1xf32>
    %84 = arith.subf %52, %83 : vector<4x1xf32>
    %85 = vector.broadcast %84 : vector<4x1xf32> to vector<4x128xf32>
    %86 = arith.addf %82, %85 : vector<4x128xf32>
    %87 = arith.truncf %86 : vector<4x128xf32> to vector<4x128xbf16>
    %cst_51 = arith.constant dense<0.000000e+00> : vector<8x128xf32>
    %88 = tpu.matmul %53, %87, %cst_51 {dimension_numbers = #tpu.dot_dimension_numbers<[1], [0], [0], [1], [0, 0, 1, 1], [], []>} : vector<8x4xbf16>, vector<4x128xbf16>, vector<8x128xf32> -> vector<8x128xf32>
    %89 = arith.addf %47, %88 : vector<8x128xf32>
    %90 = vector.broadcast %1 : vector<8x1xf32> to vector<8x128xf32>
    %91 = arith.addf %89, %90 : vector<8x128xf32>
    %92 = vector.shape_cast %0 : vector<1x128xi32> to vector<1x128xi32>
    %93 = vector.broadcast %92 : vector<1x128xi32> to vector<8x128xi32>
    %c127_i32 = arith.constant 127 : i32
    %94 = tpu.dynamic_rotate %91 by %c127_i32 dim 1 : vector<8x128xf32>, i32 -> vector<8x128xf32>
    %c1_i32 = arith.constant 1 : i32
    %95 = tpu.dynamic_rotate %91 by %c1_i32 dim 1 : vector<8x128xf32>, i32 -> vector<8x128xf32>
    %c126_i32 = arith.constant 126 : i32
    %96 = tpu.dynamic_rotate %91 by %c126_i32 dim 1 : vector<8x128xf32>, i32 -> vector<8x128xf32>
    %c2_i32 = arith.constant 2 : i32
    %97 = tpu.dynamic_rotate %91 by %c2_i32 dim 1 : vector<8x128xf32>, i32 -> vector<8x128xf32>
    %c125_i32 = arith.constant 125 : i32
    %98 = tpu.dynamic_rotate %91 by %c125_i32 dim 1 : vector<8x128xf32>, i32 -> vector<8x128xf32>
    %c3_i32 = arith.constant 3 : i32
    %99 = tpu.dynamic_rotate %91 by %c3_i32 dim 1 : vector<8x128xf32>, i32 -> vector<8x128xf32>
    %c0_i32 = arith.constant 0 : i32
    %100 = vector.broadcast %c0_i32 : i32 to vector<8x128xi32>
    %101 = arith.cmpi eq, %93, %100 : vector<8x128xi32>
    %c1_i32_52 = arith.constant 1 : i32
    %102 = vector.broadcast %c1_i32_52 : i32 to vector<8x128xi32>
    %103 = arith.cmpi eq, %93, %102 : vector<8x128xi32>
    %c2_i32_53 = arith.constant 2 : i32
    %104 = vector.broadcast %c2_i32_53 : i32 to vector<8x128xi32>
    %105 = arith.cmpi eq, %93, %104 : vector<8x128xi32>
    %c13_i32 = arith.constant 13 : i32
    %106 = vector.broadcast %c13_i32 : i32 to vector<8x128xi32>
    %107 = arith.cmpi eq, %93, %106 : vector<8x128xi32>
    %c14_i32 = arith.constant 14 : i32
    %108 = vector.broadcast %c14_i32 : i32 to vector<8x128xi32>
    %109 = arith.cmpi eq, %93, %108 : vector<8x128xi32>
    %c15_i32 = arith.constant 15 : i32
    %110 = vector.broadcast %c15_i32 : i32 to vector<8x128xi32>
    %111 = arith.cmpi eq, %93, %110 : vector<8x128xi32>
    %112 = arith.select %101, %98, %99 : vector<8x128xi1>, vector<8x128xf32>
    %113 = arith.select %103, %94, %112 : vector<8x128xi1>, vector<8x128xf32>
    %114 = arith.select %105, %95, %113 : vector<8x128xi1>, vector<8x128xf32>
    %115 = vector.extract_strided_slice %2 {offsets = [0, 0], sizes = [32, 8], strides = [1, 1]} : vector<32x56xbf16> to vector<32x8xbf16>
    %116 = arith.truncf %114 : vector<8x128xf32> to vector<8x128xbf16>
    %cst_54 = arith.constant dense<0.000000e+00> : vector<32x128xf32>
    %117 = tpu.matmul %115, %116, %cst_54 {dimension_numbers = #tpu.dot_dimension_numbers<[1], [0], [0], [1], [0, 0, 1, 1], [], []>} : vector<32x8xbf16>, vector<8x128xbf16>, vector<32x128xf32> -> vector<32x128xf32>
    %118 = arith.select %101, %96, %97 : vector<8x128xi1>, vector<8x128xf32>
    %119 = arith.select %103, %91, %118 : vector<8x128xi1>, vector<8x128xf32>
    %120 = vector.extract_strided_slice %2 {offsets = [0, 8], sizes = [32, 8], strides = [1, 1]} : vector<32x56xbf16> to vector<32x8xbf16>
    %121 = arith.truncf %119 : vector<8x128xf32> to vector<8x128xbf16>
    %cst_55 = arith.constant dense<0.000000e+00> : vector<32x128xf32>
    %122 = tpu.matmul %120, %121, %cst_55 {dimension_numbers = #tpu.dot_dimension_numbers<[1], [0], [0], [1], [0, 0, 1, 1], [], []>} : vector<32x8xbf16>, vector<8x128xbf16>, vector<32x128xf32> -> vector<32x128xf32>
    %123 = arith.addf %117, %122 : vector<32x128xf32>
    %124 = arith.select %101, %94, %95 : vector<8x128xi1>, vector<8x128xf32>
    %125 = vector.extract_strided_slice %2 {offsets = [0, 16], sizes = [32, 8], strides = [1, 1]} : vector<32x56xbf16> to vector<32x8xbf16>
    %126 = arith.truncf %124 : vector<8x128xf32> to vector<8x128xbf16>
    %cst_56 = arith.constant dense<0.000000e+00> : vector<32x128xf32>
    %127 = tpu.matmul %125, %126, %cst_56 {dimension_numbers = #tpu.dot_dimension_numbers<[1], [0], [0], [1], [0, 0, 1, 1], [], []>} : vector<32x8xbf16>, vector<8x128xbf16>, vector<32x128xf32> -> vector<32x128xf32>
    %128 = arith.addf %123, %127 : vector<32x128xf32>
    %129 = vector.extract_strided_slice %2 {offsets = [0, 24], sizes = [32, 8], strides = [1, 1]} : vector<32x56xbf16> to vector<32x8xbf16>
    %130 = arith.truncf %91 : vector<8x128xf32> to vector<8x128xbf16>
    %cst_57 = arith.constant dense<0.000000e+00> : vector<32x128xf32>
    %131 = tpu.matmul %129, %130, %cst_57 {dimension_numbers = #tpu.dot_dimension_numbers<[1], [0], [0], [1], [0, 0, 1, 1], [], []>} : vector<32x8xbf16>, vector<8x128xbf16>, vector<32x128xf32> -> vector<32x128xf32>
    %132 = arith.addf %128, %131 : vector<32x128xf32>
    %133 = arith.select %111, %95, %94 : vector<8x128xi1>, vector<8x128xf32>
    %134 = vector.extract_strided_slice %2 {offsets = [0, 32], sizes = [32, 8], strides = [1, 1]} : vector<32x56xbf16> to vector<32x8xbf16>
    %135 = arith.truncf %133 : vector<8x128xf32> to vector<8x128xbf16>
    %cst_58 = arith.constant dense<0.000000e+00> : vector<32x128xf32>
    %136 = tpu.matmul %134, %135, %cst_58 {dimension_numbers = #tpu.dot_dimension_numbers<[1], [0], [0], [1], [0, 0, 1, 1], [], []>} : vector<32x8xbf16>, vector<8x128xbf16>, vector<32x128xf32> -> vector<32x128xf32>
    %137 = arith.addf %132, %136 : vector<32x128xf32>
    %138 = arith.select %109, %91, %96 : vector<8x128xi1>, vector<8x128xf32>
    %139 = arith.select %111, %97, %138 : vector<8x128xi1>, vector<8x128xf32>
    %140 = vector.extract_strided_slice %2 {offsets = [0, 40], sizes = [32, 8], strides = [1, 1]} : vector<32x56xbf16> to vector<32x8xbf16>
    %141 = arith.truncf %139 : vector<8x128xf32> to vector<8x128xbf16>
    %cst_59 = arith.constant dense<0.000000e+00> : vector<32x128xf32>
    %142 = tpu.matmul %140, %141, %cst_59 {dimension_numbers = #tpu.dot_dimension_numbers<[1], [0], [0], [1], [0, 0, 1, 1], [], []>} : vector<32x8xbf16>, vector<8x128xbf16>, vector<32x128xf32> -> vector<32x128xf32>
    %143 = arith.addf %137, %142 : vector<32x128xf32>
    %144 = arith.select %107, %94, %98 : vector<8x128xi1>, vector<8x128xf32>
    %145 = arith.select %109, %95, %144 : vector<8x128xi1>, vector<8x128xf32>
    %146 = arith.select %111, %99, %145 : vector<8x128xi1>, vector<8x128xf32>
    %147 = vector.extract_strided_slice %2 {offsets = [0, 48], sizes = [32, 8], strides = [1, 1]} : vector<32x56xbf16> to vector<32x8xbf16>
    %148 = arith.truncf %146 : vector<8x128xf32> to vector<8x128xbf16>
    %cst_60 = arith.constant dense<0.000000e+00> : vector<32x128xf32>
    %149 = tpu.matmul %147, %148, %cst_60 {dimension_numbers = #tpu.dot_dimension_numbers<[1], [0], [0], [1], [0, 0, 1, 1], [], []>} : vector<32x8xbf16>, vector<8x128xbf16>, vector<32x128xf32> -> vector<32x128xf32>
    %150 = arith.addf %143, %149 : vector<32x128xf32>
    %151 = vector.shape_cast %0 : vector<1x128xi32> to vector<1x128xi32>
    %152 = vector.broadcast %151 : vector<1x128xi32> to vector<32x128xi32>
    %c16_i32_61 = arith.constant 16 : i32
    %153 = vector.broadcast %c16_i32_61 : i32 to vector<32x128xi32>
    %154 = arith.cmpi slt, %152, %153 : vector<32x128xi32>
    %cst_62 = arith.constant 0.000000e+00 : f32
    %155 = vector.broadcast %cst_62 : f32 to vector<32x128xf32>
    %156 = arith.select %154, %150, %155 : vector<32x128xi1>, vector<32x128xf32>
    %cst_63 = arith.constant dense<0.000000e+00> : vector<32xf32>
    %157 = vector.multi_reduction <add>, %156, %cst_63 [1] : vector<32x128xf32> to vector<32xf32>
    %158 = vector.shape_cast %157 : vector<32xf32> to vector<32x1xf32>
    %159 = arith.mulf %156, %156 : vector<32x128xf32>
    %cst_64 = arith.constant dense<0.000000e+00> : vector<32xf32>
    %160 = vector.multi_reduction <add>, %159, %cst_64 [1] : vector<32x128xf32> to vector<32xf32>
    %161 = vector.shape_cast %160 : vector<32xf32> to vector<32x1xf32>
    %cst_65 = arith.constant 3.125000e-02 : f32
    %162 = vector.broadcast %cst_65 : f32 to vector<32x1xf32>
    %163 = arith.mulf %158, %162 : vector<32x1xf32>
    %cst_66 = arith.constant 3.125000e-02 : f32
    %164 = vector.broadcast %cst_66 : f32 to vector<32x1xf32>
    %165 = arith.mulf %161, %164 : vector<32x1xf32>
    %166 = arith.mulf %163, %163 : vector<32x1xf32>
    %167 = arith.subf %165, %166 : vector<32x1xf32>
    %cst_67 = arith.constant 0.000000e+00 : f32
    %168 = vector.broadcast %cst_67 : f32 to vector<32x1xf32>
    %169 = arith.maximumf %167, %168 : vector<32x1xf32>
    %cst_68 = arith.constant 9.99999974E-6 : f32
    %170 = vector.broadcast %cst_68 : f32 to vector<32x1xf32>
    %171 = arith.addf %169, %170 : vector<32x1xf32>
    %172 = math.rsqrt %171 : vector<32x1xf32>
    %173 = arith.mulf %3, %172 : vector<32x1xf32>
    %174 = vector.broadcast %173 : vector<32x1xf32> to vector<32x128xf32>
    %175 = arith.mulf %150, %174 : vector<32x128xf32>
    %176 = arith.mulf %163, %173 : vector<32x1xf32>
    %177 = arith.subf %4, %176 : vector<32x1xf32>
    %178 = vector.broadcast %177 : vector<32x1xf32> to vector<32x128xf32>
    %179 = arith.addf %175, %178 : vector<32x128xf32>
    %cst_69 = arith.constant 0.000000e+00 : f32
    %180 = vector.broadcast %cst_69 : f32 to vector<32x128xf32>
    %181 = arith.maximumf %179, %180 : vector<32x128xf32>
    %c0_70 = arith.constant 0 : index
    %c0_71 = arith.constant 0 : index
    %182 = vector.load %arg17[%c0_70, %c0_71] : memref<32x128xf32, #tpu.memory_space<vmem>>, vector<32x128xf32>
    tpu.vector_store %arg17[%c0_70, %c0_71], %181 {strides = array<i32>} : memref<32x128xf32, #tpu.memory_space<vmem>>, vector<32x128xf32>,
    return
  }
}

</mosaic_0001>

<bundles_post_ra>
// kernel: svg_resnet_forward.5
= control target key start
LH: loop header
LB: loop body
LE: loop exit
PB: predicated region body
PF: predicated region fallthrough
CT: control target
= control target key end

     0   :  { %v645_v5 = vmov 0.0   ;;  %s646_s23 = smov 126   ;;  %s647_s24 = smov 2   ;;  %v649_v7 = vmov 1983009808   ;;  %v110_v9 = vlaneseq  ;;  %vm651_vm0 = vmmov 0   ;;  %s993_s1 = inlined_call_operand.vmem [shape: f32[32,128], index: 1, kind: input, shape index: {}]   ;;  %s994_s2 = inlined_call_operand.vmem [shape: bf16[3,224], index: 2, kind: input, shape index: {}]   ;;  %s995_s3 = inlined_call_operand.vmem [shape: f32[3,1], index: 3, kind: input, shape index: {}]   ;;  %s996_s0 = inlined_call_operand.vmem [shape: s32[1,128], index: 0, kind: input, shape index: {}]   ;;  %s997_s4 = inlined_call_operand.vmem [shape: f32[3,128], index: 4, kind: output, shape index: {}]  }
   0x1   :  { %v686_v0 = vld [vmem:[%s993_s1 + $0x10] sm:$0xff]  ;;  %v691_v1 = vld [vmem:[%s993_s1 + $0x18] sm:$0xff]  ;;  %v696_v2 = vld [vmem:[%s993_s1] sm:$0xff]  ;;  %512 = vmatprep.subr.bf16.mxu0 %v645_v5  ;;  %520 = vmatprep.subr.bf16.mxu1 %v645_v5  ;;  %s648_s25 = smov 125   ;;  %v108_v8 = vunpack.c.l.s4 %v649_v7  ;;  %s652_s26 = smov 127   ;;  %v657_v16 = vmov 0  }
   0x2   :  { %v581_v3 = vpack.i.bf16 %v691_v1, %v686_v0  ;;  %v703_v4 = vld [vmem:[%s993_s1 + $0x8] sm:$0xff]  ;;  %s650_s1 = smov 3   ;;  %516 = vmatprep.mubr.msk.bf16.mxu0 %vm651_vm0, %v645_v5  ;;  %524 = vmatprep.mubr.msk.bf16.mxu1 %vm651_vm0, %v645_v5  ;;  %v111_v11 = vshrl.u32 %v110_v9, 7  ;;  %s653_s27 = smov 1   ;;  %v716_v13 = vld [vmem:[%s994_s2] sm:$0xf] }
   0x3   :  { %v591_v6 = vpack.i.bf16 %v703_v4, %v696_v2  ;;  %v109_v10 = vunpack.c.0.s8 %v108_v8  ;;  %s654_s30 = smov 96   ;;  %s655_s5 = smov 64   ;;  %641 = vset.pattern.permute.xlu1 %v657_v16  ;;  %v470_v17 = vld [vmem:[%s995_s3] sm:$0x7]  ;;  %642 = vset.pattern.permute.xlu0 %v657_v16  ;;  %vm116_vm4 = vcmask 261120  }
   0x4   :  { %582 = vrot.lane.b32.xlu0 %v581_v3, %s646_s23  ;;  %s656_s6 = smov 32   ;;  %v733_v20 = vld [vmem:[%s996_s0] ss:$0 sm:$0xff] }
   0x5   :  { %592 = vrot.lane.b32.xlu1 %v591_v6, %s646_s23  ;;  %v112_v12 = vsub.s32 %v109_v10, %v111_v11  ;;  %vm76_vm1 = vcmp.eq.s32.totalorder %v733_v20, 0  ;;  %vm77_vm2 = vcmp.eq.s32.totalorder %v733_v20, 1  ;;  %vm78_vm3 = vcmp.eq.s32.totalorder %v733_v20, 2 }
   0x6   :  { %vm81_vm5 = vcmp.eq.s32.totalorder %v733_v20, 15  ;;  %vm79_vm6 = vcmp.eq.s32.totalorder %v733_v20, 13  ;;  %vm80_vm7 = vcmp.eq.s32.totalorder %v733_v20, 14 }
   0x7   :  { %v113_v14 = vrot.slane %v716_v13, %v112_v12 }
   0x8   :  { %587 = vrot.lane.b32.xlu0 %v581_v3, %s647_s24 }
   0x9   :  { %597 = vrot.lane.b32.xlu1 %v591_v6, %s647_s24  ;;  %v719_v15 = vcombine.high %v113_v14, %v113_v14 }
   0xc   :  { %602 = vrot.lane.b32.xlu0 %v581_v3, %s648_s25 }
   0xd   :  { %607 = vrot.lane.b32.xlu1 %v581_v3, %s650_s1 }
  0x10   :  { %612 = vrot.lane.b32.xlu0 %v581_v3, %s652_s26 }
  0x11   :  { %617 = vrot.lane.b32.xlu1 %v581_v3, %s653_s27 }
  0x14   :  { %622 = vrot.lane.b32.xlu0 %v591_v6, %s648_s25 }
  0x15   :  { %627 = vrot.lane.b32.xlu1 %v591_v6, %s650_s1 }
  0x18   :  { %632 = vrot.lane.b32.xlu0 %v591_v6, %s652_s26 }
  0x19   :  { %637 = vrot.lane.b32.xlu1 %v591_v6, %s653_s27 }
  0x1c   :  { %114 = vrot.lane.b32.xlu0 %v113_v14, %s654_s30 }
  0x1d   :  { %209 = vrot.lane.b32.xlu1 %v113_v14, %s655_s5 }
  0x20   :  { %257 = vrot.lane.b32.xlu0 %v113_v14, %s656_s6 }
  0x21   :  { %364 = vrot.lane.b32.xlu1 %v719_v15, %s654_s30 }
  0x24   :  { %424 = vrot.lane.b32.xlu0 %v719_v15, %s655_s5 }
  0x25   :  { %473 = vperm.xlu1 %641, %v470_v17  }
  0x76   :  { %v726_v18 = vpop.permute.xlu0 %582 }
  0x77   :  { %v728_v19 = vpop.permute.xlu1 %592  ;;  %v585_v22 = vunpack.i.h.bf16 %v726_v18  ;;  %v584_v23 = vunpack.i.l.bf16 %v726_v18 }
  0x78   :  { %v595_v29 = vunpack.i.h.bf16 %v728_v19  ;;  %v594_v30 = vunpack.i.l.bf16 %v728_v19 }
  0x7a   :  { %v736_v21 = vpop.permute.xlu0 %587 }
  0x7b   :  { %v590_v24 = vunpack.i.h.bf16 %v736_v21  ;;  %v589_v25 = vunpack.i.l.bf16 %v736_v21  ;;  %v742_v26 = vpop.permute.xlu1 %597  ;;  %v355_v21 = vsel %vm80_vm7, %v703_v4, %v595_v29 }
  0x7c   :  { %v600_v27 = vunpack.i.h.bf16 %v742_v26  ;;  %v599_v28 = vunpack.i.l.bf16 %v742_v26 }
  0x7d   :  { %v98_v31 = vsel %vm76_vm1, %v584_v23, %v589_v25  ;;  %v99_v32 = vsel %vm76_vm1, %v585_v22, %v590_v24 }
  0x7e   :  { %v761_v33 = vpop.permute.xlu0 %602  ;;  %v96_v34 = vsel %vm76_vm1, %v594_v30, %v599_v28  ;;  %v97_v35 = vsel %vm76_vm1, %v595_v29, %v600_v27  ;;  %v102_v38 = vsel %vm77_vm2, %v686_v0, %v98_v31  ;;  %v103_v42 = vsel %vm77_vm2, %v691_v1, %v99_v32 }
  0x7f   :  { %v605_v36 = vunpack.i.h.bf16 %v761_v33  ;;  %v776_v37 = vpop.permute.xlu1 %607  ;;  %v604_v39 = vunpack.i.l.bf16 %v761_v33  ;;  %v105_v43 = vpack.c.bf16 %v103_v42, %v102_v38  ;;  %v100_v45 = vsel %vm77_vm2, %v696_v2, %v96_v34 }
  0x80   :  { %v610_v40 = vunpack.i.h.bf16 %v776_v37  ;;  %v609_v41 = vunpack.i.l.bf16 %v776_v37  ;;  %v101_v46 = vsel %vm77_vm2, %v703_v4, %v97_v35  ;;  %v357_v33 = vsel %vm80_vm7, %v691_v1, %v585_v22 }
  0x81   :  { %513 = vmatpush3.bf16.msra.mxu0 %v105_v43  ;;  %v104_v54 = vpack.c.bf16 %v101_v46, %v100_v45  ;;  %v361_v22 = vsel %vm81_vm5, %v590_v24, %v357_v33 }
  0x82   :  { %v613_v44 = vpop.permute.xlu0 %612  ;;  %v84_v50 = vsel %vm76_vm1, %v604_v39, %v609_v41  ;;  %v85_v51 = vsel %vm76_vm1, %v605_v36, %v610_v40  ;;  %514 = vmatprep.subr.bf16.mxu0 %v645_v5 }
  0x83   :  { %v793_v47 = vunpack.i.h.bf16 %v613_v44  ;;  %v614_v48 = vunpack.i.l.bf16 %v613_v44  ;;  %v618_v49 = vpop.permute.xlu1 %617 }
  0x84   :  { %v808_v52 = vunpack.i.h.bf16 %v618_v49  ;;  %v810_v53 = vunpack.i.l.bf16 %v618_v49  ;;  %v256_v49 = vpack.c.bf16 %v691_v1, %v686_v0 }
  0x85   :  { %v88_v55 = vsel %vm77_vm2, %v614_v48, %v84_v50  ;;  %v89_v56 = vsel %vm77_vm2, %v793_v47, %v85_v51  ;;  %515 = vmatpush3.bf16.msra.mxu0 %v104_v54 }
  0x86   :  { %v818_v57 = vpop.permute.xlu0 %622  ;;  %v92_v58 = vsel %vm78_vm3, %v810_v53, %v88_v55  ;;  %v93_v59 = vsel %vm78_vm3, %v808_v52, %v89_v56  ;;  %528 = vmatprep.subr.bf16.mxu0 %v645_v5  ;;  %v205_v11 = vsel %vm76_vm1, %v614_v48, %v810_v53  ;;  %v206_v12 = vsel %vm76_vm1, %v793_v47, %v808_v52 }
  0x87   :  { %v826_v60 = vpop.permute.xlu1 %627  ;;  %v95_v61 = vpack.c.bf16 %v93_v59, %v92_v58  ;;  %v625_v62 = vunpack.i.h.bf16 %v818_v57  ;;  %v624_v63 = vunpack.i.l.bf16 %v818_v57  ;;  %v208_v38 = vpack.c.bf16 %v206_v12, %v205_v11 }
  0x88   :  { %v630_v3 = vunpack.i.h.bf16 %v826_v60  ;;  %v629_v6 = vunpack.i.l.bf16 %v826_v60  ;;  %v305_v51 = vsel %vm81_vm5, %v810_v53, %v614_v48  ;;  %v306_v54 = vsel %vm81_vm5, %v808_v52, %v793_v47 }
  0x89   :  { %521 = vmatpush3.bf16.msra.mxu1 %v95_v61  ;;  %v412_v56 = vsel %vm79_vm6, %v614_v48, %v604_v39  ;;  %v413_v58 = vsel %vm79_vm6, %v793_v47, %v605_v36  ;;  %v255_v59 = vpack.c.bf16 %v703_v4, %v696_v2  ;;  %v308_v39 = vpack.c.bf16 %v306_v54, %v305_v51 }
  0x8a   :  { %v633_v7 = vpop.permute.xlu0 %632  ;;  %522 = vmatprep.subr.bf16.mxu1 %v645_v5  ;;  %v82_v14 = vsel %vm76_vm1, %v624_v63, %v629_v6  ;;  %v83_v16 = vsel %vm76_vm1, %v625_v62, %v630_v3  ;;  %v354_v36 = vsel %vm80_vm7, %v696_v2, %v594_v30  ;;  %v416_v2 = vsel %vm80_vm7, %v810_v53, %v412_v56 }
  0x8b   :  { %v635_v8 = vunpack.i.h.bf16 %v633_v7  ;;  %v634_v9 = vunpack.i.l.bf16 %v633_v7  ;;  %v638_v10 = vpop.permute.xlu1 %637  ;;  %v358_v4 = vsel %vm81_vm5, %v599_v28, %v354_v36  ;;  %v420_v29 = vsel %vm81_vm5, %v609_v41, %v416_v2 }
  0x8c   :  { %v640_v17 = vunpack.i.h.bf16 %v638_v10  ;;  %v639_v31 = vunpack.i.l.bf16 %v638_v10 }
  0x8d   :  { %v86_v32 = vsel %vm77_vm2, %v634_v9, %v82_v14  ;;  %v87_v34 = vsel %vm77_vm2, %v635_v8, %v83_v16  ;;  %v410_v24 = vsel %vm79_vm6, %v634_v9, %v624_v63 }
  0x8e   :  { %v115_v35 = vpop.permute.xlu0 %114  ;;  %v90_v42 = vsel %vm78_vm3, %v639_v31, %v86_v32  ;;  %v91_v43 = vsel %vm78_vm3, %v640_v17, %v87_v34  ;;  %v203_v45 = vsel %vm76_vm1, %v634_v9, %v639_v31  ;;  %v204_v46 = vsel %vm76_vm1, %v635_v8, %v640_v17 }
  0x8f   :  { %517 = vmatmul.mubr.msk.bf16.vlgmr.msra.gmra.mxu0 %vm116_vm4, %v115_v35  ;;  %v94_v44 = vpack.c.bf16 %v91_v43, %v90_v42  ;;  %v207_v50 = vpack.c.bf16 %v204_v46, %v203_v45  ;;  %v210_v55 = vpop.permute.xlu1 %209  ;;  %v303_v1 = vsel %vm81_vm5, %v639_v31, %v634_v9  ;;  %v304_v18 = vsel %vm81_vm5, %v640_v17, %v635_v8 }
  0x90   :  { %529 = vmatpush3.bf16.msra.mxu0 %v208_v38  ;;  %532 = vmatprep.mubr.msk.bf16.mxu0 %vm651_vm0, %v645_v5  ;;  %v307_v47 = vpack.c.bf16 %v304_v18, %v303_v1  ;;  %v414_v53 = vsel %vm80_vm7, %v639_v31, %v410_v24 }
  0x91   :  { %523 = vmatpush3.bf16.msra.mxu1 %v94_v44  ;;  %530 = vmatprep.subr.bf16.mxu0 %v645_v5 }
  0x92   :  { %536 = vmatprep.subr.bf16.mxu1 %v645_v5  ;;  %v258_v30 = vpop.permute.xlu0 %257 }
  0x93   :  { %v365_v41 = vpop.permute.xlu1 %364 }
  0x94   :  { %531 = vmatpush3.bf16.msra.mxu0 %v207_v50  ;;  %525 = vmatmul.mubr.msk.bf16.vlgmr.msra.gmra.mxu1 %vm116_vm4, %v716_v13  ;;  %v356_v13 = vsel %vm80_vm7, %v686_v0, %v584_v23  ;;  %v417_v23 = vsel %vm80_vm7, %v808_v52, %v413_v58  ;;  %v359_v52 = vsel %vm81_vm5, %v600_v27, %v355_v21 }
  0x95   :  { %537 = vmatpush3.bf16.msra.mxu1 %v256_v49  ;;  %544 = vmatprep.subr.bf16.mxu0 %v645_v5  ;;  %v360_v0 = vsel %vm81_vm5, %v589_v25, %v356_v13  ;;  %v411_v25 = vsel %vm79_vm6, %v635_v8, %v625_v62  ;;  %v421_v48 = vsel %vm81_vm5, %v610_v40, %v417_v23 }
  0x96   :  { %538 = vmatprep.subr.bf16.mxu1 %v645_v5  ;;  %540 = vmatprep.mubr.msk.bf16.mxu1 %vm651_vm0, %v645_v5  ;;  %v363_v19 = vpack.c.bf16 %v361_v22, %v360_v0  ;;  %v415_v28 = vsel %vm80_vm7, %v640_v17, %v411_v25  ;;  %v423_v37 = vpack.c.bf16 %v421_v48, %v420_v29 }
  0x97   :  { %533 = vmatmul.mubr.msk.bf16.vlgmr.msra.gmra.mxu0 %vm116_vm4, %v210_v55  ;;  %v362_v26 = vpack.c.bf16 %v359_v52, %v358_v4  ;;  %v418_v27 = vsel %vm81_vm5, %v629_v6, %v414_v53  ;;  %v419_v40 = vsel %vm81_vm5, %v630_v3, %v415_v28 }
  0x98   :  { %545 = vmatpush3.bf16.msra.mxu0 %v308_v39  ;;  %548 = vmatprep.mubr.msk.bf16.mxu0 %vm651_vm0, %v645_v5  ;;  %v422_v57 = vpack.c.bf16 %v419_v40, %v418_v27 }
  0x99   :  { %539 = vmatpush3.bf16.msra.mxu1 %v255_v59  ;;  %546 = vmatprep.subr.bf16.mxu0 %v645_v5 }
  0x9a   :  { %552 = vmatprep.subr.bf16.mxu1 %v645_v5 }
  0x9c   :  { %547 = vmatpush3.bf16.msra.mxu0 %v307_v47  ;;  %541 = vmatmul.mubr.msk.bf16.vlgmr.msra.gmra.mxu1 %vm116_vm4, %v258_v30 }
  0x9d   :  { %553 = vmatpush3.bf16.msra.mxu1 %v363_v19  ;;  %560 = vmatprep.subr.bf16.mxu0 %v645_v5 }
  0x9e   :  { %554 = vmatprep.subr.bf16.mxu1 %v645_v5  ;;  %556 = vmatprep.mubr.msk.bf16.mxu1 %vm651_vm0, %v645_v5 }
  0x9f   :  { %549 = vmatmul.mubr.msk.bf16.vlgmr.msra.gmra.mxu0 %vm116_vm4, %v719_v15  ;;  %v425_v15 = vpop.permute.xlu0 %424 }
  0xa0   :  { %561 = vmatpush3.bf16.msra.mxu0 %v423_v37  ;;  %564 = vmatprep.mubr.msk.bf16.mxu0 %vm651_vm0, %v645_v5  ;;  %v474_v50 = vpop.permute.xlu1 %473 }
  0xa1   :  { %555 = vmatpush3.bf16.msra.mxu1 %v362_v26  ;;  %562 = vmatprep.subr.bf16.mxu0 %v645_v5 }
  0xa4   :  { %563 = vmatpush3.bf16.msra.mxu0 %v422_v57  ;;  %557 = vmatmul.mubr.msk.bf16.vlgmr.msra.gmra.mxu1 %vm116_vm4, %v365_v41 }
  0xa7   :  { %565 = vmatmul.mubr.msk.bf16.vlgmr.msra.gmra.mxu0 %vm116_vm4, %v425_v15 }
 0x14f   :  { %v154_v61 = vpop.f32.mrf.mxu0 }
 0x151   :  { %v518_v60 = vpop.f32.mrf.mxu0 }
 0x153   :  { %v157_v62 = vpop.f32.mrf.mxu0 }
 0x154   :  { %v197_v20 = vpop.f32.mrf.mxu1 }
 0x155   :  { %v519_v63 = vpop.f32.mrf.mxu0  ;;  %v198_v8 = vadd.f32 %v197_v20, %v154_v61 }
 0x156   :  { %v526_v3 = vpop.f32.mrf.mxu1 }
 0x157   :  { %v248_v6 = vpop.f32.mrf.mxu0 }
 0x158   :  { %v200_v7 = vpop.f32.mrf.mxu1  ;;  %v254_v12 = vadd.f32 %v248_v6, %v198_v8 }
 0x159   :  { %v534_v9 = vpop.f32.mrf.mxu0 }
 0x15a   :  { %v527_v10 = vpop.f32.mrf.mxu1 }
 0x15b   :  { %v251_v5 = vpop.f32.mrf.mxu0 }
 0x15c   :  { %v296_v11 = vpop.f32.mrf.mxu1 }
 0x15d   :  { %v535_v14 = vpop.f32.mrf.mxu0  ;;  %v302_v17 = vadd.f32 %v296_v11, %v254_v12 }
 0x15e   :  { %v542_v16 = vpop.f32.mrf.mxu1 }
 0x15f   :  { %v347_v31 = vpop.f32.mrf.mxu0 }
 0x160   :  { %v299_v32 = vpop.f32.mrf.mxu1  ;;  %v353_v38 = vadd.f32 %v347_v31, %v302_v17 }
 0x161   :  { %v550_v34 = vpop.f32.mrf.mxu0 }
 0x162   :  { %v543_v35 = vpop.f32.mrf.mxu1 }
 0x163   :  { %v350_v42 = vpop.f32.mrf.mxu0 }
 0x164   :  { %v403_v43 = vpop.f32.mrf.mxu1 }
 0x165   :  { %v409_v44 = vadd.f32 %v403_v43, %v353_v38  ;;  %v551_v45 = vpop.f32.mrf.mxu0 }
 0x166   :  { %v558_v46 = vpop.f32.mrf.mxu1 }
 0x167   :  { %v463_v49 = vpop.f32.mrf.mxu0 }
 0x168   :  { %v469_v51 = vadd.f32 %v463_v49, %v409_v44  ;;  %v406_v54 = vpop.f32.mrf.mxu1 }
 0x169   :  { %v566_v55 = vpop.f32.mrf.mxu0 }
 0x16a   :  { %v476_v56 = vadd.f32 %v474_v50, %v469_v51  ;;  %v559_v58 = vpop.f32.mrf.mxu1 }
 0x16b   :  { %v466_v59 = vpop.f32.mrf.mxu0 }
 0x16c   :  { %643 = vtanh.f32 %v476_v56 }
 0x16d   :  { %v567_v13 = vpop.f32.mrf.mxu0 }
 0x179   :  { %v644_v33 = vpop.eup %643 }
 0x17a   :  { %478 = vst [vmem:[%s997_s4] sm:$0x7] %v644_v33 }

// kernel: svg_resnet_forward.4
= control target key start
LH: loop header
LB: loop body
LE: loop exit
PB: predicated region body
PF: predicated region fallthrough
CT: control target
= control target key end

     0   :  { %s1446_s27 = smov 0   ;;  %s1691_s0 = inlined_call_operand.vmem [shape: s32[1,128], index: 0, kind: input, shape index: {}]   ;;  %s1692_s1 = inlined_call_operand.vmem [shape: f32[32,128], index: 1, kind: input, shape index: {}]   ;;  %s1693_s2 = inlined_call_operand.vmem [shape: bf16[2,32,96], index: 2, kind: input, shape index: {}]   ;;  %s1694_s3 = inlined_call_operand.vmem [shape: f32[2,32,1], index: 3, kind: input, shape index: {}]   ;;  %s1695_s4 = inlined_call_operand.vmem [shape: f32[2,32,1], index: 4, kind: input, shape index: {}]   ;;  %s1696_s5 = inlined_call_operand.vmem [shape: bf16[2,32,96], index: 5, kind: input, shape index: {}]   ;;  %s1697_s6 = inlined_call_operand.vmem [shape: f32[2,32,1], index: 6, kind: input, shape index: {}]   ;;  %s1698_s7 = inlined_call_operand.vmem [shape: f32[2,32,1], index: 7, kind: input, shape index: {}]   ;;  %s1699_s8 = inlined_call_operand.vmem [shape: f32[32,128], index: 8, kind: output, shape index: {}]  }
   0x1 LB: > { %s1199_s28 = sadd.s32 4294967295, %s1394_s27   ;;  %p1202_p0 = scmp.ge.s32.totalorder %s1394_s27, 1  ;;  %s1394_s27 = sphi %s1446_s27, %s18_s27  }
   0x2   : > { %p307_p1 = scmp.lt.s32.totalorder %s1394_s27, 3 }
   0x4   : > { %p308_p2 = pnand %p1202_p0, %p307_p1 }
   0x5   : > { %p361_p3 = scmp.lt.s32.totalorder (!%p308_p2), %s1199_s28, 1  ;;  %p1215_p4 = scmp.ne.s32.totalorder (!%p308_p2), %s1199_s28, 0 }
   0x6   : > { %311 = sbr.rel (%p308_p2) target bundleno = 1330 (0x532), region = 52 }
   0xb   : > { %s362_s29 = scalar_select %p361_p3, %s1199_s28, 1 }
   0xc   : > { %395 = sbr.rel (%p1215_p4) target bundleno = 20 (0x14), region = 56 }
   0xd   : > { %s1235_s30 = sshll.u32 %s362_s29, 4  ;;  %s1236_s9 = sshll.u32 %s362_s29, 5 }
   0xe   : > { %s1457_s12 = scalar_lea.vmem %s1693_s2, %s1235_s30  ;;  %s1462_s15 = scalar_lea.vmem %s1694_s3, %s1236_s9 }
   0xf   : > { %s1467_s18 = scalar_lea.vmem %s1695_s4, %s1236_s9  ;;  %s1472_s21 = scalar_lea.vmem %s1696_s5, %s1235_s30 }
  0x10   : > { %s1477_s24 = scalar_lea.vmem %s1697_s6, %s1236_s9  ;;  %s1482_s29 = scalar_lea.vmem %s1698_s7, %s1236_s9 }
  0x11   : > { %v396_v0 = vld [vmem:[%s1692_s1] sm:$0xff]  ;;  %v397_v1 = vld [vmem:[%s1692_s1 + $0x8] sm:$0xff]  ;;  %v398_v2 = vld [vmem:[%s1692_s1 + $0x10] sm:$0xff] }
  0x12   : > { %400 = vst [vmem:[%s1699_s8] sm:$0xff] %v396_v0  ;;  %401 = vst [vmem:[%s1699_s8 + $0x8] sm:$0xff] %v397_v1  ;;  %v399_v3 = vld [vmem:[%s1692_s1 + $0x18] sm:$0xff] }
  0x13   : > { %402 = vst [vmem:[%s1699_s8 + $0x10] sm:$0xff] %v398_v2  ;;  %403 = vst [vmem:[%s1699_s8 + $0x18] sm:$0xff] %v399_v3 }
  0x14 PF: > { %s1396_s20 = smov 127   ;;  %v1368_v12 = vld [vmem:[%s1457_s12] sm:$0xff]   ;;  %vm457_vm0 = vcmask 261120   ;;  %s1397_s28 = smov 1   ;;  %v1369_v13 = vld [vmem:[%s1457_s12 + $0x8] sm:$0xff]  }
  0x15   : > { %1277 = vmatprep.mubr.msk.bf16.mxu1 %vm457_vm0, %v1368_v12  ;;  %s1398_s22 = smov 96   ;;  %s1399_s23 = smov 64   ;;  %v1550_v16 = vld [vmem:[%s1691_s0] ss:$0 sm:$0xff] }
  0x16   : > { %vm433_vm1 = vcmp.eq.s32.totalorder %v1550_v16, 0  ;;  %vm434_vm2 = vcmp.eq.s32.totalorder %v1550_v16, 15  ;;  %vm645_vm3 = vcmp.lt.s32.totalorder %v1550_v16, 16 }
  0x19   : > { %v1521_v6 = vld [vmem:[%s1699_s8] sm:$0xff]  ;;  %v1528_v8 = vld [vmem:[%s1699_s8 + $0x8] sm:$0xff] }
  0x1a   : > { %v1511_v4 = vld [vmem:[%s1699_s8 + $0x10] sm:$0xff]  ;;  %v1516_v5 = vld [vmem:[%s1699_s8 + $0x18] sm:$0xff]  ;;  %v1336_v10 = vpack.i.bf16 %v1528_v8, %v1521_v6  ;;  %v441_v11 = vpack.c.bf16 %v1528_v8, %v1521_v6 }
  0x1b   : > { %v1326_v7 = vpack.i.bf16 %v1516_v5, %v1511_v4  ;;  %v442_v9 = vpack.c.bf16 %v1516_v5, %v1511_v4 }
  0x1c   : > { %1337 = vrot.lane.b32.xlu1 %v1336_v10, %s1396_s20 }
  0x1d   : > { %1327 = vrot.lane.b32.xlu0 %v1326_v7, %s1396_s20  ;;  %1265 = vmatprep.subr.bf16.mxu0 %v442_v9 }
  0x1e   : > { %1266 = vmatpush3.bf16.msra.mxu0 %v442_v9 }
  0x1f   : > { %1267 = vmatprep.subr.bf16.mxu0 %v441_v11 }
  0x20   : > { %1342 = vrot.lane.b32.xlu1 %v1336_v10, %s1397_s28 }
  0x21   : > { %1332 = vrot.lane.b32.xlu0 %v1326_v7, %s1397_s28 }
  0x22   : > { %1268 = vmatpush3.bf16.msra.mxu0 %v441_v11  ;;  %v1400_v11 = vmov 0  }
  0x23   : > { %1346 = vset.pattern.permute.xlu1 %v1400_v11  ;;  %1347 = vset.pattern.permute.xlu0 %v1400_v11  ;;  %v642_v11 = vld [vmem:[%s1467_s18 + $0x8] sm:$0xff] }
  0x24   : > { %455 = vrot.lane.b32.xlu1 %v1369_v13, %s1398_s22 }
  0x25   : > { %453 = vrot.lane.b32.xlu0 %v1368_v12, %s1398_s22 }
  0x28   : > { %576 = vrot.lane.b32.xlu1 %v1369_v13, %s1399_s23 }
  0x29   : > { %574 = vrot.lane.b32.xlu0 %v1368_v12, %s1399_s23 }
  0x8e   : > { %v1338_v15 = vpop.permute.xlu1 %1337 }
  0x8f   : > { %v1328_v14 = vpop.permute.xlu0 %1327  ;;  %v1340_v17 = vunpack.i.h.bf16 %v1338_v15  ;;  %v1339_v18 = vunpack.i.l.bf16 %v1338_v15 }
  0x90   : > { %v1330_v20 = vunpack.i.h.bf16 %v1328_v14  ;;  %v1329_v21 = vunpack.i.l.bf16 %v1328_v14 }
  0x92   : > { %v1343_v24 = vpop.permute.xlu1 %1342 }
  0x93   : > { %v1333_v19 = vpop.permute.xlu0 %1332  ;;  %v1345_v25 = vunpack.i.h.bf16 %v1343_v24  ;;  %v1344_v26 = vunpack.i.l.bf16 %v1343_v24 }
  0x94   : > { %v1335_v22 = vunpack.i.h.bf16 %v1333_v19  ;;  %v1334_v23 = vunpack.i.l.bf16 %v1333_v19 }
  0x95   : > { %v435_v34 = vsel %vm433_vm1, %v1339_v18, %v1344_v26  ;;  %v436_v35 = vsel %vm433_vm1, %v1340_v17, %v1345_v25  ;;  %v568_v37 = vsel %vm434_vm2, %v1344_v26, %v1339_v18  ;;  %v569_v38 = vsel %vm434_vm2, %v1345_v25, %v1340_v17 }
  0x96   : > { %v437_v27 = vsel %vm433_vm1, %v1329_v21, %v1334_v23  ;;  %v438_v28 = vsel %vm433_vm1, %v1330_v20, %v1335_v22  ;;  %v570_v29 = vsel %vm434_vm2, %v1334_v23, %v1329_v21  ;;  %v571_v30 = vsel %vm434_vm2, %v1335_v22, %v1330_v20  ;;  %v456_v36 = vpop.permute.xlu1 %455 }
  0x97   : > { %v454_v31 = vpop.permute.xlu0 %453  ;;  %v440_v32 = vpack.c.bf16 %v438_v28, %v437_v27  ;;  %v573_v33 = vpack.c.bf16 %v571_v30, %v570_v29  ;;  %v439_v39 = vpack.c.bf16 %v436_v35, %v435_v34  ;;  %v572_v40 = vpack.c.bf16 %v569_v38, %v568_v37 }
  0x98   : > { %1269 = vmatprep.mubr.msk.bf16.mxu0 %vm457_vm0, %v454_v31 }
  0x99   : > { %1270 = vmatmul.mubr.msk.bf16.vlgmr.msra.gmra.mxu0 %vm457_vm0, %v456_v36  ;;  %1273 = vmatprep.subr.bf16.mxu1 %v440_v32 }
  0x9a   : > { %1281 = vmatprep.subr.bf16.mxu0 %v573_v33  ;;  %1274 = vmatpush3.bf16.msra.mxu1 %v440_v32  ;;  %v577_v42 = vpop.permute.xlu1 %576 }
  0x9b   : > { %1282 = vmatpush3.bf16.msra.mxu0 %v573_v33  ;;  %1275 = vmatprep.subr.bf16.mxu1 %v439_v39  ;;  %v575_v41 = vpop.permute.xlu0 %574 }
  0x9c   : > { %1283 = vmatprep.subr.bf16.mxu0 %v572_v40  ;;  %1285 = vmatprep.mubr.msk.bf16.mxu0 %vm457_vm0, %v575_v41 }
  0x9e   : > { %1276 = vmatpush3.bf16.msra.mxu1 %v439_v39 }
  0x9f   : > { %1284 = vmatpush3.bf16.msra.mxu0 %v572_v40 }
  0xa1   : > { %1278 = vmatmul.mubr.msk.bf16.vlgmr.msra.gmra.mxu1 %vm457_vm0, %v1369_v13 }
  0xa2   : > { %1286 = vmatmul.mubr.msk.bf16.vlgmr.msra.gmra.mxu0 %vm457_vm0, %v577_v42 }
 0x159   : > { %v1271_v43 = vpop.f32.mrf.mxu0 }
 0x15b   : > { %v498_v44 = vpop.f32.mrf.mxu0 }
 0x15d   : > { %v1272_v45 = vpop.f32.mrf.mxu0 }
 0x15f   : > { %v501_v46 = vpop.f32.mrf.mxu0 }
 0x161   : > { %v1279_v47 = vpop.f32.mrf.mxu1 }
 0x162   : > { %v562_v48 = vadd.f32 %v1279_v47, %v1271_v43  ;;  %v1287_v49 = vpop.f32.mrf.mxu0 }
 0x163   : > { %v553_v50 = vpop.f32.mrf.mxu1 }
 0x164   : > { %v1576_v51 = vadd.f32 %v1287_v49, %v562_v48  ;;  %v618_v52 = vpop.f32.mrf.mxu0  ;;  %v554_v54 = vadd.f32 %v553_v50, %v498_v44  ;;  %v640_v48 = vld [vmem:[%s1462_s15 + $0x18] sm:$0xff] }
 0x165   : > { %v1280_v53 = vpop.f32.mrf.mxu1 }
 0x166   : > { %v565_v55 = vadd.f32 %v1280_v53, %v1272_v45  ;;  %v648_v56 = vsel %vm645_vm3, %v1576_v51, 0.0  ;;  %v1288_v57 = vpop.f32.mrf.mxu0  ;;  %v1583_v61 = vadd.f32 %v618_v52, %v554_v54  ;;  %v639_v45 = vld [vmem:[%s1462_s15 + $0x10] sm:$0xff]  ;;  %v637_v52 = vld [vmem:[%s1462_s15] sm:$0xff] }
 0x167   : > { %654 = vadd.xlane.f32.xlu0 %v648_v56  ;;  %v556_v58 = vpop.f32.mrf.mxu1  ;;  %v660_v60 = vmul.f32 %v648_v56, %v648_v56  ;;  %v643_v56 = vld [vmem:[%s1467_s18 + $0x10] sm:$0xff] }
 0x168   : > { %v1581_v59 = vadd.f32 %v1288_v57, %v565_v55  ;;  %v557_v62 = vadd.f32 %v556_v58, %v501_v46  ;;  %v621_v0 = vpop.f32.mrf.mxu0  ;;  %v646_v2 = vsel %vm645_vm3, %v1583_v61, 0.0 }
 0x169   : > { %v658_v7 = vmul.f32 %v646_v2, %v646_v2 }
 0x16a   : > { %v649_v63 = vsel %vm645_vm3, %v1581_v59, 0.0  ;;  %v1591_v3 = vadd.f32 %v621_v0, %v557_v62  ;;  %v641_v0 = vld [vmem:[%s1467_s18] sm:$0xff] }
 0x16b   : > { %666 = vadd.xlane.f32.xlu0 %v660_v60  ;;  %656 = vadd.xlane.f32.xlu1 %v649_v63  ;;  %v661_v1 = vmul.f32 %v649_v63, %v649_v63  ;;  %v638_v60 = vld [vmem:[%s1462_s15 + $0x8] sm:$0xff] }
 0x16c   : > { %v647_v9 = vsel %vm645_vm3, %v1591_v3, 0.0 }
 0x16d   : > { %v659_v10 = vmul.f32 %v647_v9, %v647_v9 }
 0x16f   : > { %668 = vadd.xlane.f32.xlu0 %v661_v1  ;;  %650 = vadd.xlane.f32.xlu1 %v646_v2 }
 0x173   : > { %652 = vadd.xlane.f32.xlu0 %v647_v9  ;;  %662 = vadd.xlane.f32.xlu1 %v658_v7  ;;  %v644_v7 = vld [vmem:[%s1467_s18 + $0x18] sm:$0xff] }
 0x177   : > { %664 = vadd.xlane.f32.xlu0 %v659_v10 }
 0x1f0   : > { %v655_v12 = vpop.xlane.xlu0 %654 }
 0x1f1   : > { %v672_v13 = vmul.f32 0.03125, %v655_v12 }
 0x1f3   : > { %v680_v17 = vmul.f32 %v672_v13, %v672_v13 }
 0x1f4   : > { %v667_v14 = vpop.xlane.xlu0 %666  ;;  %v657_v15 = vpop.xlane.xlu1 %656 }
 0x1f5   : > { %v676_v18 = vmul.f32 0.03125, %v667_v14  ;;  %v673_v19 = vmul.f32 0.03125, %v657_v15 }
 0x1f7   : > { %v684_v20 = vsub.f32 %v676_v18, %v680_v17  ;;  %v681_v24 = vmul.f32 %v673_v19, %v673_v19 }
 0x1f8   : > { %v669_v21 = vpop.xlane.xlu0 %668  ;;  %v651_v22 = vpop.xlane.xlu1 %650 }
 0x1f9   : > { %v688_v23 = vmax.f32 %v684_v20, 0.0  ;;  %v677_v25 = vmul.f32 0.03125, %v669_v21  ;;  %v670_v26 = vmul.f32 0.03125, %v651_v22 }
 0x1fb   : > { %v692_v27 = vadd.f32 1e-05, %v688_v23  ;;  %v685_v28 = vsub.f32 %v677_v25, %v681_v24  ;;  %v678_v29 = vmul.f32 %v670_v26, %v670_v26 }
 0x1fc   : > { %v653_v30 = vpop.xlane.xlu0 %652  ;;  %v663_v31 = vpop.xlane.xlu1 %662 }
 0x1fd   : > { %1372 = vrsqrt.f32 %v692_v27  ;;  %v689_v32 = vmax.f32 %v685_v28, 0.0  ;;  %v671_v33 = vmul.f32 0.03125, %v653_v30  ;;  %v674_v34 = vmul.f32 0.03125, %v663_v31 }
 0x1ff   : > { %v693_v35 = vadd.f32 1e-05, %v689_v32  ;;  %v682_v36 = vsub.f32 %v674_v34, %v678_v29  ;;  %v679_v38 = vmul.f32 %v671_v33, %v671_v33 }
 0x200   : > { %v665_v37 = vpop.xlane.xlu0 %664 }
 0x201   : > { %1374 = vrsqrt.f32 %v693_v35  ;;  %v686_v39 = vmax.f32 %v682_v36, 0.0  ;;  %v675_v40 = vmul.f32 0.03125, %v665_v37 }
 0x203   : > { %v690_v41 = vadd.f32 1e-05, %v686_v39  ;;  %v683_v42 = vsub.f32 %v675_v40, %v679_v38 }
 0x205   : > { %1376 = vrsqrt.f32 %v690_v41  ;;  %v687_v43 = vmax.f32 %v683_v42, 0.0 }
 0x207   : > { %v691_v44 = vadd.f32 1e-05, %v687_v43 }
 0x209   : > { %1378 = vrsqrt.f32 %v691_v44 }
 0x20a   : > { %v1373_v46 = vpop.eup %1372 }
 0x20b   : > { %v700_v47 = vmul.f32 %v1373_v46, %v639_v45 }
 0x20d   : > { %714 = vperm.xlu1 %1346, %v700_v47   ;;  %v728_v55 = vmul.f32 %v700_v47, %v672_v13  ;;  %v1370_v13 = vld [vmem:[%s1472_s21] sm:$0xff]  }
 0x20e   : > { %v1375_v49 = vpop.eup %1374  ;;  %1301 = vmatprep.mubr.msk.bf16.mxu0 %vm457_vm0, %v1370_v13 }
 0x20f   : > { %v701_v50 = vmul.f32 %v1375_v49, %v640_v48  ;;  %v732_v57 = vsub.f32 %v643_v56, %v728_v55 }
 0x211   : > { %719 = vperm.xlu0 %1347, %v701_v50   ;;  %v729_v2 = vmul.f32 %v701_v50, %v673_v19 }
 0x212   : > { %v1377_v53 = vpop.eup %1376 }
 0x213   : > { %v698_v54 = vmul.f32 %v1377_v53, %v637_v52  ;;  %v733_v9 = vsub.f32 %v644_v7, %v729_v2 }
 0x215   : > { %704 = vperm.xlu1 %1346, %v698_v54   ;;  %v726_v63 = vmul.f32 %v698_v54, %v670_v26 }
 0x216   : > { %v1379_v58 = vpop.eup %1378 }
 0x217   : > { %v699_v62 = vmul.f32 %v1379_v58, %v638_v60  ;;  %v730_v1 = vsub.f32 %v641_v0, %v726_v63 }
 0x219   : > { %746 = vperm.xlu1 %1346, %v732_v57   ;;  %v727_v10 = vmul.f32 %v699_v62, %v671_v33 }
 0x21b   : > { %v731_v12 = vsub.f32 %v642_v11, %v727_v10 }
 0x21d   : > { %709 = vperm.xlu1 %1346, %v699_v62  }
 0x221   : > { %736 = vperm.xlu1 %1346, %v730_v1  }
 0x225   : > { %751 = vperm.xlu1 %1346, %v733_v9  }
 0x229   : > { %741 = vperm.xlu1 %1346, %v731_v12  }
 0x288   : > { %v715_v14 = vpop.permute.xlu1 %714 }
 0x289   : > { %v724_v22 = vmul.f32 %v715_v14, %v1576_v51 }
 0x28c   : > { %v720_v20 = vpop.permute.xlu0 %719 }
 0x28d   : > { %v725_v19 = vmul.f32 %v720_v20, %v1581_v59 }
 0x290   : > { %v705_v15 = vpop.permute.xlu1 %704 }
 0x291   : > { %v722_v25 = vmul.f32 %v705_v15, %v1583_v61  ;;  %v1371_v61 = vld [vmem:[%s1472_s21 + $0x8] sm:$0xff]  }
 0x294   : > { %v747_v17 = vpop.permute.xlu1 %746 }
 0x295   : > { %v756_v23 = vadd.f32 %v747_v17, %v724_v22 }
 0x297   : > { %v760_v27 = vmax.f32 %v756_v23, 0.0 }
 0x298   : > { %v710_v18 = vpop.permute.xlu1 %709 }
 0x299   : > { %v723_v28 = vmul.f32 %v710_v18, %v1591_v3 }
 0x29c   : > { %v737_v21 = vpop.permute.xlu1 %736 }
 0x29d   : > { %v754_v29 = vadd.f32 %v737_v21, %v722_v25 }
 0x29f   : > { %v758_v35 = vmax.f32 %v754_v29, 0.0 }
 0x2a0   : > { %v752_v24 = vpop.permute.xlu1 %751 }
 0x2a1   : > { %v757_v26 = vadd.f32 %v752_v24, %v725_v19 }
 0x2a3   : > { %v761_v30 = vmax.f32 %v757_v26, 0.0 }
 0x2a4   : > { %v742_v31 = vpop.permute.xlu1 %741 }
 0x2a5   : > { %v755_v32 = vadd.f32 %v742_v31, %v723_v28  ;;  %v1348_v33 = vpack.i.bf16 %v761_v30, %v760_v27  ;;  %v789_v34 = vpack.c.bf16 %v761_v30, %v760_v27 }
 0x2a7   : > { %v759_v36 = vmax.f32 %v755_v32, 0.0  ;;  %1349 = vrot.lane.b32.xlu1 %v1348_v33, %s1396_s20  ;;  %1289 = vmatprep.subr.bf16.mxu1 %v789_v34 }
 0x2a8   : > { %1290 = vmatpush3.bf16.msra.mxu1 %v789_v34 }
 0x2a9   : > { %v1358_v51 = vpack.i.bf16 %v759_v36, %v758_v35  ;;  %v788_v59 = vpack.c.bf16 %v759_v36, %v758_v35 }
 0x2ab   : > { %1354 = vrot.lane.b32.xlu1 %v1348_v33, %s1397_s28  ;;  %1359 = vrot.lane.b32.xlu0 %v1358_v51, %s1396_s20 }
 0x2ac   : > { %1291 = vmatprep.subr.bf16.mxu1 %v788_v59 }
 0x2ad   : > { %1292 = vmatpush3.bf16.msra.mxu1 %v788_v59 }
 0x2af   : > { %1364 = vrot.lane.b32.xlu1 %v1358_v51, %s1397_s28  ;;  %800 = vrot.lane.b32.xlu0 %v1370_v13, %s1398_s22 }
 0x2b3   : > { %802 = vrot.lane.b32.xlu1 %v1371_v61, %s1398_s22  ;;  %920 = vrot.lane.b32.xlu0 %v1370_v13, %s1399_s23 }
 0x2b7   : > { %922 = vrot.lane.b32.xlu1 %v1371_v61, %s1399_s23 }
 0x319   : > { %v1350_v3 = vpop.permute.xlu1 %1349 }
 0x31a   : > { %v1352_v39 = vunpack.i.h.bf16 %v1350_v3  ;;  %v1351_v40 = vunpack.i.l.bf16 %v1350_v3 }
 0x31d   : > { %v1360_v37 = vpop.permute.xlu0 %1359  ;;  %v1355_v38 = vpop.permute.xlu1 %1354 }
 0x31e   : > { %v1357_v41 = vunpack.i.h.bf16 %v1355_v38  ;;  %v1356_v42 = vunpack.i.l.bf16 %v1355_v38  ;;  %v1362_v52 = vunpack.i.h.bf16 %v1360_v37  ;;  %v1361_v53 = vunpack.i.l.bf16 %v1360_v37 }
 0x320   : > { %v784_v43 = vsel %vm433_vm1, %v1351_v40, %v1356_v42  ;;  %v785_v44 = vsel %vm433_vm1, %v1352_v39, %v1357_v41  ;;  %v916_v45 = vsel %vm434_vm2, %v1356_v42, %v1351_v40  ;;  %v917_v46 = vsel %vm434_vm2, %v1357_v41, %v1352_v39 }
 0x321   : > { %v1365_v47 = vpop.permute.xlu1 %1364  ;;  %v787_v48 = vpack.c.bf16 %v785_v44, %v784_v43  ;;  %v919_v49 = vpack.c.bf16 %v917_v46, %v916_v45  ;;  %v801_v50 = vpop.permute.xlu0 %800 }
 0x322   : > { %v1367_v54 = vunpack.i.h.bf16 %v1365_v47  ;;  %v1366_v55 = vunpack.i.l.bf16 %v1365_v47  ;;  %1293 = vmatprep.mubr.msk.bf16.mxu1 %vm457_vm0, %v801_v50 }
 0x323   : > { %1297 = vmatprep.subr.bf16.mxu0 %v787_v48  ;;  %1305 = vmatprep.subr.bf16.mxu1 %v919_v49 }
 0x324   : > { %1298 = vmatpush3.bf16.msra.mxu0 %v787_v48  ;;  %v782_v56 = vsel %vm433_vm1, %v1361_v53, %v1366_v55  ;;  %v783_v57 = vsel %vm433_vm1, %v1362_v52, %v1367_v54  ;;  %v914_v58 = vsel %vm434_vm2, %v1366_v55, %v1361_v53  ;;  %v915_v60 = vsel %vm434_vm2, %v1367_v54, %v1362_v52 }
 0x325   : > { %v803_v62 = vpop.permute.xlu1 %802  ;;  %v786_v63 = vpack.c.bf16 %v783_v57, %v782_v56  ;;  %v918_v0 = vpack.c.bf16 %v915_v60, %v914_v58  ;;  %v921_v1 = vpop.permute.xlu0 %920 }
 0x326   : > { %1294 = vmatmul.mubr.msk.bf16.vlgmr.msra.gmra.mxu1 %vm457_vm0, %v803_v62 }
 0x327   : > { %1306 = vmatpush3.bf16.msra.mxu1 %v919_v49  ;;  %1299 = vmatprep.subr.bf16.mxu0 %v786_v63 }
 0x328   : > { %1307 = vmatprep.subr.bf16.mxu1 %v918_v0  ;;  %1300 = vmatpush3.bf16.msra.mxu0 %v786_v63 }
 0x329   : > { %1309 = vmatprep.mubr.msk.bf16.mxu1 %vm457_vm0, %v921_v1  ;;  %v923_v2 = vpop.permute.xlu1 %922 }
 0x32b   : > { %1308 = vmatpush3.bf16.msra.mxu1 %v918_v0  ;;  %1302 = vmatmul.mubr.msk.bf16.vlgmr.msra.gmra.mxu0 %vm457_vm0, %v1371_v61 }
 0x32e   : > { %1310 = vmatmul.mubr.msk.bf16.vlgmr.msra.gmra.mxu1 %vm457_vm0, %v923_v2 }
 0x3e6   : > { %v1295_v7 = vpop.f32.mrf.mxu1 }
 0x3e8   : > { %v844_v9 = vpop.f32.mrf.mxu1 }
 0x3ea   : > { %v1296_v10 = vpop.f32.mrf.mxu1 }
 0x3eb   : > { %v1303_v11 = vpop.f32.mrf.mxu0 }
 0x3ec   : > { %v908_v12 = vadd.f32 %v1303_v11, %v1295_v7  ;;  %v847_v13 = vpop.f32.mrf.mxu1  ;;  %v984_v11 = vld [vmem:[%s1477_s24 + $0x8] sm:$0xff] }
 0x3ed   : > { %v899_v14 = vpop.f32.mrf.mxu0 }
 0x3ee   : > { %v900_v15 = vadd.f32 %v899_v14, %v844_v9  ;;  %v1311_v17 = vpop.f32.mrf.mxu1  ;;  %v983_v9 = vld [vmem:[%s1477_s24] sm:$0xff] }
 0x3ef   : > { %v1640_v18 = vadd.f32 %v1311_v17, %v908_v12  ;;  %v1304_v20 = vpop.f32.mrf.mxu0  ;;  %v985_v12 = vld [vmem:[%s1477_s24 + $0x10] sm:$0xff] }
 0x3f0   : > { %v964_v21 = vpop.f32.mrf.mxu1  ;;  %v911_v22 = vadd.f32 %v1304_v20, %v1296_v10 }
 0x3f1   : > { %v1642_v19 = vadd.f32 %v964_v21, %v900_v15  ;;  %v902_v23 = vpop.f32.mrf.mxu0  ;;  %v993_v24 = vsel %vm645_vm3, %v1640_v18, 0.0  ;;  %v987_v21 = vld [vmem:[%s1482_s29] sm:$0xff] }
 0x3f2   : > { %v903_v25 = vadd.f32 %v902_v23, %v847_v13  ;;  %v1312_v26 = vpop.f32.mrf.mxu1  ;;  %999 = vadd.xlane.f32.xlu0 %v993_v24  ;;  %v1005_v35 = vmul.f32 %v993_v24, %v993_v24  ;;  %v989_v24 = vld [vmem:[%s1482_s29 + $0x10] sm:$0xff] }
 0x3f3   : > { %v991_v27 = vsel %vm645_vm3, %v1642_v19, 0.0  ;;  %v1650_v30 = vadd.f32 %v1312_v26, %v911_v22  ;;  %v986_v26 = vld [vmem:[%s1477_s24 + $0x18] sm:$0xff] }
 0x3f4   : > { %v967_v28 = vpop.f32.mrf.mxu1  ;;  %v1003_v29 = vmul.f32 %v991_v27, %v991_v27 }
 0x3f5   : > { %v1652_v31 = vadd.f32 %v967_v28, %v903_v25  ;;  %v994_v32 = vsel %vm645_vm3, %v1650_v30, 0.0 }
 0x3f6   : > { %995 = vadd.xlane.f32.xlu0 %v991_v27  ;;  %1007 = vadd.xlane.f32.xlu1 %v1003_v29  ;;  %v1006_v36 = vmul.f32 %v994_v32, %v994_v32 }
 0x3f7   : > { %v992_v33 = vsel %vm645_vm3, %v1652_v31, 0.0 }
 0x3f8   : > { %v1004_v34 = vmul.f32 %v992_v33, %v992_v33 }
 0x3fa   : > { %1001 = vadd.xlane.f32.xlu0 %v994_v32  ;;  %997 = vadd.xlane.f32.xlu1 %v992_v33  ;;  %v988_v32 = vld [vmem:[%s1482_s29 + $0x8] sm:$0xff] }
 0x3fe   : > { %1009 = vadd.xlane.f32.xlu0 %v1004_v34  ;;  %1011 = vadd.xlane.f32.xlu1 %v1005_v35  ;;  %v990_v35 = vld [vmem:[%s1482_s29 + $0x18] sm:$0xff] }
 0x402   : > { %1013 = vadd.xlane.f32.xlu0 %v1006_v36 }
 0x47b   : > { %v1000_v51 = vpop.xlane.xlu0 %999 }
 0x47c   : > { %v1017_v39 = vmul.f32 0.03125, %v1000_v51 }
 0x47e   : > { %v1025_v44 = vmul.f32 %v1017_v39, %v1017_v39 }
 0x47f   : > { %v996_v59 = vpop.xlane.xlu0 %995  ;;  %v1008_v61 = vpop.xlane.xlu1 %1007 }
 0x480   : > { %v1015_v3 = vmul.f32 0.03125, %v996_v59  ;;  %v1019_v38 = vmul.f32 0.03125, %v1008_v61 }
 0x482   : > { %v1023_v37 = vmul.f32 %v1015_v3, %v1015_v3 }
 0x483   : > { %v1002_v40 = vpop.xlane.xlu0 %1001  ;;  %v998_v41 = vpop.xlane.xlu1 %997 }
 0x484   : > { %v1027_v42 = vsub.f32 %v1019_v38, %v1023_v37  ;;  %v1016_v16 = vmul.f32 0.03125, %v998_v41  ;;  %v1018_v45 = vmul.f32 0.03125, %v1002_v40 }
 0x486   : > { %v1031_v43 = vmax.f32 %v1027_v42, 0.0  ;;  %v1024_v49 = vmul.f32 %v1016_v16, %v1016_v16  ;;  %v1026_v56 = vmul.f32 %v1018_v45, %v1018_v45 }
 0x487   : > { %v1010_v46 = vpop.xlane.xlu0 %1009  ;;  %v1012_v47 = vpop.xlane.xlu1 %1011 }
 0x488   : > { %v1035_v48 = vadd.f32 1e-05, %v1031_v43  ;;  %v1020_v50 = vmul.f32 0.03125, %v1010_v46  ;;  %v1021_v52 = vmul.f32 0.03125, %v1012_v47 }
 0x48a   : > { %1380 = vrsqrt.f32 %v1035_v48  ;;  %v1028_v53 = vsub.f32 %v1020_v50, %v1024_v49  ;;  %v1029_v54 = vsub.f32 %v1021_v52, %v1025_v44 }
 0x48b   : > { %v1014_v55 = vpop.xlane.xlu0 %1013 }
 0x48c   : > { %v1032_v57 = vmax.f32 %v1028_v53, 0.0  ;;  %v1033_v58 = vmax.f32 %v1029_v54, 0.0  ;;  %v1022_v60 = vmul.f32 0.03125, %v1014_v55 }
 0x48e   : > { %v1036_v62 = vadd.f32 1e-05, %v1032_v57  ;;  %v1037_v63 = vadd.f32 1e-05, %v1033_v58  ;;  %v1030_v0 = vsub.f32 %v1022_v60, %v1026_v56 }
 0x490   : > { %1382 = vrsqrt.f32 %v1036_v62  ;;  %v1034_v1 = vmax.f32 %v1030_v0, 0.0 }
 0x491   : > { %1384 = vrsqrt.f32 %v1037_v63 }
 0x492   : > { %v1038_v2 = vadd.f32 1e-05, %v1034_v1 }
 0x494   : > { %1386 = vrsqrt.f32 %v1038_v2 }
 0x497   : > { %v1381_v7 = vpop.eup %1380 }
 0x498   : > { %v1043_v10 = vmul.f32 %v1381_v7, %v983_v9 }
 0x49a   : > { %v1071_v17 = vmul.f32 %v1043_v10, %v1015_v3 }
 0x49c   : > { %v1075_v22 = vsub.f32 %v987_v21, %v1071_v17 }
 0x49d   : > { %v1383_v13 = vpop.eup %1382 }
 0x49e   : > { %v1385_v14 = vpop.eup %1384  ;;  %v1044_v15 = vmul.f32 %v1383_v13, %v984_v11 }
 0x49f   : > { %v1045_v20 = vmul.f32 %v1385_v14, %v985_v12 }
 0x4a0   : > { %1054 = vperm.xlu0 %1347, %v1044_v15   ;;  %v1072_v29 = vmul.f32 %v1044_v15, %v1016_v16 }
 0x4a1   : > { %1059 = vperm.xlu1 %1346, %v1045_v20   ;;  %v1073_v23 = vmul.f32 %v1045_v20, %v1017_v39  ;;  %v1387_v25 = vpop.eup %1386 }
 0x4a2   : > { %v1046_v28 = vmul.f32 %v1387_v25, %v986_v26  ;;  %v1076_v33 = vsub.f32 %v988_v32, %v1072_v29 }
 0x4a3   : > { %v1077_v27 = vsub.f32 %v989_v24, %v1073_v23 }
 0x4a4   : > { %1081 = vperm.xlu0 %1347, %v1075_v22   ;;  %v1074_v34 = vmul.f32 %v1046_v28, %v1018_v45 }
 0x4a5   : > { %1049 = vperm.xlu1 %1346, %v1043_v10  }
 0x4a6   : > { %v1078_v36 = vsub.f32 %v990_v35, %v1074_v34 }
 0x4a8   : > { %1091 = vperm.xlu0 %1347, %v1077_v27  }
 0x4a9   : > { %1064 = vperm.xlu1 %1346, %v1046_v28  }
 0x4ad   : > { %1086 = vperm.xlu1 %1346, %v1076_v33  }
 0x4b1   : > { %1096 = vperm.xlu1 %1346, %v1078_v36  }
 0x51b   : > { %v1055_v51 = vpop.permute.xlu0 %1054 }
 0x51c   : > { %v1060_v59 = vpop.permute.xlu1 %1059  ;;  %v1068_v44 = vmul.f32 %v1055_v51, %v1652_v31 }
 0x51d   : > { %v1069_v38 = vmul.f32 %v1060_v59, %v1640_v18 }
 0x51f   : > { %v1082_v61 = vpop.permute.xlu0 %1081 }
 0x520   : > { %v1050_v3 = vpop.permute.xlu1 %1049 }
 0x521   : > { %v1067_v37 = vmul.f32 %v1050_v3, %v1642_v19 }
 0x523   : > { %v1099_v39 = vadd.f32 %v1082_v61, %v1067_v37  ;;  %v1092_v40 = vpop.permute.xlu0 %1091 }
 0x524   : > { %v1065_v41 = vpop.permute.xlu1 %1064  ;;  %v1101_v42 = vadd.f32 %v1092_v40, %v1069_v38 }
 0x525   : > { %v1103_v16 = vadd.f32 %v1099_v39, %v1521_v6  ;;  %v1070_v45 = vmul.f32 %v1065_v41, %v1650_v30 }
 0x526   : > { %v1105_v43 = vadd.f32 %v1101_v42, %v1511_v4 }
 0x527   : > { %1107 = vst [vmem:[%s1699_s8] sm:$0xff] %v1103_v16 }
 0x528   : > { %1109 = vst [vmem:[%s1699_s8 + $0x10] sm:$0xff] %v1105_v43  ;;  %v1087_v19 = vpop.permute.xlu1 %1086 }
 0x529   : > { %v1100_v18 = vadd.f32 %v1087_v19, %v1068_v44 }
 0x52b   : > { %v1104_v46 = vadd.f32 %v1100_v18, %v1528_v8 }
 0x52c   : > { %v1097_v47 = vpop.permute.xlu1 %1096 }
 0x52d   : > { %1108 = vst [vmem:[%s1699_s8 + $0x8] sm:$0xff] %v1104_v46  ;;  %v1102_v4 = vadd.f32 %v1097_v47, %v1070_v45 }
 0x52f   : > { %v1106_v6 = vadd.f32 %v1102_v4, %v1516_v5 }
 0x531   : > { %1110 = vst [vmem:[%s1699_s8 + $0x18] sm:$0xff] %v1106_v6 }
 0x532 PF: > { %s18_s27 = sadd.s32 1, %s1394_s27  }
 0x533   : > { %p15_p5 = scmp.ge.s32.totalorder %s18_s27, 4  }
 0x535   :  { %17 = sbr.rel (!%p15_p5) target bundleno = 1 (0x1), region = 97 }

// kernel: svg_resnet_forward.3
= control target key start
LH: loop header
LB: loop body
LE: loop exit
PB: predicated region body
PF: predicated region fallthrough
CT: control target
= control target key end

     0   :  { %vm87_vm0 = vcmask 1040384   ;;  %vm88_vm1 = vcmask 1041408   ;;  %v1140_v0 = vmov 0.0   ;;  %v1141_v2 = vmov 65535   ;;  %s1146_s30 = smov 2   ;;  %s1147_s18 = smov 120   ;;  %s1456_s1 = inlined_call_operand.vmem [shape: f32[3,128], index: 1, kind: input, shape index: {}]   ;;  %s1457_s7 = inlined_call_operand.vmem [shape: f32[5,128], index: 7, kind: input, shape index: {}]   ;;  %s1458_s3 = inlined_call_operand.vmem [shape: f32[4,1], index: 3, kind: input, shape index: {}]   ;;  %s1459_s2 = inlined_call_operand.vmem [shape: bf16[4,3], index: 2, kind: input, shape index: {}]   ;;  %s1460_s8 = inlined_call_operand.vmem [shape: bf16[4,5], index: 8, kind: input, shape index: {}]   ;;  %s1461_s9 = inlined_call_operand.vmem [shape: f32[4,1], index: 9, kind: input, shape index: {}]   ;;  %s1462_s0 = inlined_call_operand.vmem [shape: s32[1,128], index: 0, kind: input, shape index: {}]   ;;  %s1463_s13 = inlined_call_operand.vmem [shape: f32[8,1], index: 13, kind: input, shape index: {}]   ;;  %s1464_s4 = inlined_call_operand.vmem [shape: f32[4,1], index: 4, kind: input, shape index: {}]   ;;  %s1465_s10 = inlined_call_operand.vmem [shape: f32[4,1], index: 10, kind: input, shape index: {}]   ;;  %s1466_s5 = inlined_call_operand.vmem [shape: f32[4,1], index: 5, kind: input, shape index: {}]   ;;  %s1467_s11 = inlined_call_operand.vmem [shape: f32[4,1], index: 11, kind: input, shape index: {}]   ;;  %s1468_s6 = inlined_call_operand.vmem [shape: bf16[8,4], index: 6, kind: input, shape index: {}]   ;;  %s1469_s12 = inlined_call_operand.vmem [shape: bf16[8,4], index: 12, kind: input, shape index: {}]   ;;  %s1470_s14 = inlined_call_operand.vmem [shape: bf16[32,56], index: 14, kind: input, shape index: {}]   ;;  %s1471_s15 = inlined_call_operand.vmem [shape: f32[32,1], index: 15, kind: input, shape index: {}]   ;;  %s1472_s16 = inlined_call_operand.vmem [shape: f32[32,1], index: 16, kind: input, shape index: {}]   ;;  %s1473_s17 = inlined_call_operand.vmem [shape: f32[32,128], index: 17, kind: output, shape index: {}]  }
   0x1   :  { %1474 = sst [smem:[#allocation2_spill]] %s1456_s1  ;;  %1035 = vmatprep.subr.bf16.mxu0 %v1140_v0  ;;  %1041 = vmatprep.subr.bf16.mxu1 %v1140_v0  ;;  %v89_v3 = vsel %vm87_vm0, 4294967295, %v1141_v2  ;;  %vm187_vm2 = vcmask 1042432   ;;  %v188_v8 = vsel %vm88_vm1, 4294967295, %v1141_v2  ;;  %vm1142_vm3 = vmmov 0   ;;  %v58_v38 = vld [vmem:[%s1463_s13] sm:$0xff] }
   0x2   :  { %1475 = sst [smem:[#allocation3_spill]] %s1457_s7  ;;  %v90_v6 = vsel %vm88_vm1, %v89_v3, 0  ;;  %v189_v9 = vsel %vm187_vm2, %v188_v8, 0  ;;  %1037 = vmatprep.mubr.msk.bf16.mxu0 %vm1142_vm3, %v1140_v0  ;;  %1043 = vmatprep.mubr.msk.bf16.mxu1 %vm1142_vm3, %v1140_v0  ;;  %v73_v12 = vld [vmem:[%s1458_s3] sm:$0xf]  ;;  %v1143_v13 = vmov 0  }
   0x3   :  { %s1476_s26 = sld [smem:[#allocation2_spill]]  ;;  %1124 = vset.pattern.permute.xlu0 %v1143_v13  ;;  %1125 = vset.pattern.permute.xlu1 %v1143_v13  ;;  %v72_v14 = vld [vmem:[%s1459_s2] sm:$0x3]  ;;  %vm83_vm4 = vcmask 23552   ;;  %vm183_vm5 = vcmask 39936   ;;  %vm140_vm7 = vcmask 1043456  }
   0x4   :  { %s1477_s29 = sld [smem:[#allocation3_spill]]  ;;  %v172_v15 = vld [vmem:[%s1460_s8] sm:$0x3]  ;;  %80 = vperm.xlu0 %1124, %v73_v12   ;;  %vm264_vm8 = vcmask 31744   ;;  %vm402_vm9 = vcmask 64512   ;;  %s1148_s20 = smov 125  }
   0x5   :  { %v173_v16 = vld [vmem:[%s1461_s9] sm:$0xf]  ;;  %s1149_s21 = smov 112   ;;  %s1150_s22 = smov 3  }
   0x6   :  { %v1273_v18 = vld [vmem:[%s1462_s0] ss:$0 sm:$0xff]  ;;  %s1151_s2 = smov 104   ;;  %s1152_s3 = smov 127  }
   0x7   :  { %vm138_vm6 = vcmp.lt.s32.totalorder %v1273_v18, 16  ;;  %v74_v55 = vld [vmem:[%s1464_s4] sm:$0xf]  ;;  %s1153_s0 = smov 96   ;;  %s1155_s8 = smov 80   ;;  %vm375_vm10 = vcmp.eq.s32.totalorder %v1273_v18, 0 }
   0x8   :  { %180 = vperm.xlu0 %1124, %v173_v16   ;;  %v174_v58 = vld [vmem:[%s1465_s10] sm:$0xf]  ;;  %vm376_vm11 = vcmp.eq.s32.totalorder %v1273_v18, 1  ;;  %vm377_vm12 = vcmp.eq.s32.totalorder %v1273_v18, 2  ;;  %vm379_vm13 = vcmp.eq.s32.totalorder %v1273_v18, 14  ;;  %vm380_vm14 = vcmp.eq.s32.totalorder %v1273_v18, 15 }
   0x9   :  { %v71_v1 = vld [vmem:[%s1476_s26] sm:$0x7]  ;;  %vm378_vm15 = vcmp.eq.s32.totalorder %v1273_v18, 13 }
   0xa   :  { %v171_v4 = vld [vmem:[%s1477_s29] sm:$0x1f]  ;;  %v77_v5 = vpack.c.bf16 %v71_v1, %v71_v1  ;;  %s1145_s29 = smov 126  }
   0xb   :  { %v177_v7 = vpack.c.bf16 %v171_v4, %v171_v4  ;;  %v75_v62 = vld [vmem:[%s1466_s5] sm:$0xf] }
   0xc   :  { %v92_v10 = vand.u32 %v90_v6, %v77_v5  ;;  %v175_v1 = vld [vmem:[%s1467_s11] sm:$0xf] }
   0xd   :  { %v191_v11 = vand.u32 %v189_v9, %v177_v7  ;;  %v76_v13 = vld [vmem:[%s1468_s6] sm:$0xf]  ;;  %s1144_s6 = smov 1  }
   0xe   :  { %1036 = vmatpush3.bf16.msra.mxu0 %v92_v10  ;;  %v176_v16 = vld [vmem:[%s1469_s12] sm:$0xf] }
   0xf   :  { %1042 = vmatpush3.bf16.msra.mxu1 %v191_v11  ;;  %1047 = vmatprep.subr.bf16.mxu0 %v1140_v0 }
  0x10   :  { %1053 = vmatprep.subr.bf16.mxu1 %v1140_v0 }
  0x11   :  { %1038 = vmatmul.mubr.msk.bf16.vlgmr.msra.gmra.mxu0 %vm83_vm4, %v72_v14 }
  0x12   :  { %1044 = vmatmul.mubr.msk.bf16.vlgmr.msra.gmra.mxu1 %vm183_vm5, %v172_v15  ;;  %1049 = vmatprep.mubr.msk.bf16.mxu0 %vm1142_vm3, %v1140_v0 }
  0x13   :  { %1055 = vmatprep.mubr.msk.bf16.mxu1 %vm1142_vm3, %v1140_v0 }
  0x7f   :  { %v81_v17 = vpop.permute.xlu0 %80 }
  0x83   :  { %v181_v19 = vpop.permute.xlu0 %180 }
  0xd1   :  { %v128_v21 = vpop.f32.mrf.mxu0 }
  0xd2   :  { %v227_v20 = vpop.f32.mrf.mxu1  ;;  %v1278_v23 = vadd.f32 %v128_v21, %v81_v17 }
  0xd3   :  { %v1276_v22 = vadd.f32 %v227_v20, %v181_v19  ;;  %v1039_v24 = vpop.f32.mrf.mxu0 }
  0xd4   :  { %v1045_v25 = vpop.f32.mrf.mxu1  ;;  %v139_v26 = vsel %vm138_vm6, %v1278_v23, 0.0 }
  0xd5   :  { %v131_v27 = vpop.f32.mrf.mxu0  ;;  %v141_v29 = vsel %vm140_vm7, %v139_v26, 0.0  ;;  %v144_v30 = vmul.f32 %v139_v26, %v139_v26  ;;  %v233_v31 = vsel %vm138_vm6, %v1276_v22, 0.0 }
  0xd6   :  { %v230_v28 = vpop.f32.mrf.mxu1  ;;  %142 = vadd.xlane.f32.xlu1 %v141_v29  ;;  %v234_v35 = vsel %vm140_vm7, %v233_v31, 0.0  ;;  %v237_v36 = vmul.f32 %v233_v31, %v233_v31 }
  0xd7   :  { %v1040_v32 = vpop.f32.mrf.mxu0  ;;  %v145_v34 = vsel %vm140_vm7, %v144_v30, 0.0  ;;  %v1322_v28 = vld [vmem:[%s1470_s14 + $0x8] sm:$0xff]   ;;  %v1126_v30 = vld [vmem:[%s1470_s14] sm:$0xff]   ;;  %s1154_s14 = smov 88  }
  0xd8   :  { %v1046_v33 = vpop.f32.mrf.mxu1  ;;  %146 = vadd.xlane.f32.xlu0 %v145_v34  ;;  %v238_v37 = vsel %vm140_vm7, %v237_v36, 0.0 }
  0xda   :  { %235 = vadd.xlane.f32.xlu1 %v234_v35 }
  0xde   :  { %239 = vadd.xlane.f32.xlu1 %v238_v37 }
  0xee   :  { %359 = vperm.xlu0 %1124, %v58_v38  }
 0x15f   :  { %v143_v39 = vpop.xlane.xlu1 %142 }
 0x160   :  { %v148_v40 = vmul.f32 0.03125, %v143_v39 }
 0x161   :  { %v147_v41 = vpop.xlane.xlu0 %146 }
 0x162   :  { %v150_v42 = vmul.f32 %v148_v40, %v148_v40  ;;  %v149_v43 = vmul.f32 0.03125, %v147_v41 }
 0x163   :  { %v236_v44 = vpop.xlane.xlu1 %235 }
 0x164   :  { %v151_v45 = vsub.f32 %v149_v43, %v150_v42  ;;  %v241_v46 = vmul.f32 0.03125, %v236_v44 }
 0x166   :  { %v152_v47 = vmax.f32 %v151_v45, 0.0  ;;  %v243_v50 = vmul.f32 %v241_v46, %v241_v46 }
 0x167   :  { %v240_v48 = vpop.xlane.xlu1 %239 }
 0x168   :  { %v153_v49 = vadd.f32 1e-05, %v152_v47  ;;  %v242_v51 = vmul.f32 0.03125, %v240_v48 }
 0x16a   :  { %1128 = vrsqrt.f32 %v153_v49  ;;  %v244_v52 = vsub.f32 %v242_v51, %v243_v50 }
 0x16c   :  { %v245_v53 = vmax.f32 %v244_v52, 0.0 }
 0x16e   :  { %v246_v54 = vadd.f32 1e-05, %v245_v53 }
 0x170   :  { %1130 = vrsqrt.f32 %v246_v54 }
 0x177   :  { %v1129_v56 = vpop.eup %1128 }
 0x178   :  { %v155_v57 = vmul.f32 %v1129_v56, %v74_v55 }
 0x17a   :  { %158 = vperm.xlu1 %1125, %v155_v57   ;;  %v162_v61 = vmul.f32 %v155_v57, %v148_v40 }
 0x17c   :  { %v163_v63 = vsub.f32 %v75_v62, %v162_v61 }
 0x17d   :  { %v1131_v59 = vpop.eup %1130 }
 0x17e   :  { %v248_v60 = vmul.f32 %v1131_v59, %v174_v58 }
 0x180   :  { %251 = vperm.xlu1 %1125, %v248_v60   ;;  %v255_v0 = vmul.f32 %v248_v60, %v241_v46 }
 0x182   :  { %v256_v2 = vsub.f32 %v175_v1, %v255_v0 }
 0x184   :  { %166 = vperm.xlu1 %1125, %v163_v63  }
 0x188   :  { %259 = vperm.xlu1 %1125, %v256_v2  }
 0x1f5   :  { %v159_v3 = vpop.permute.xlu1 %158 }
 0x1f6   :  { %v161_v5 = vmul.f32 %v159_v3, %v1278_v23 }
 0x1fb   :  { %v252_v4 = vpop.permute.xlu1 %251 }
 0x1fc   :  { %v254_v8 = vmul.f32 %v252_v4, %v1276_v22  ;;  %v360_v22 = vpop.permute.xlu0 %359 }
 0x1ff   :  { %v167_v6 = vpop.permute.xlu1 %166 }
 0x200   :  { %v169_v7 = vadd.f32 %v167_v6, %v161_v5 }
 0x202   :  { %v170_v9 = vpack.c.bf16 %v169_v7, %v169_v7 }
 0x203   :  { %v260_v10 = vpop.permute.xlu1 %259 }
 0x204   :  { %v315_v11 = vsel %vm88_vm1, %v170_v9, 0  ;;  %v262_v12 = vadd.f32 %v260_v10, %v254_v8 }
 0x205   :  { %1054 = vmatpush3.bf16.msra.mxu1 %v315_v11 }
 0x206   :  { %v263_v14 = vpack.c.bf16 %v262_v12, %v262_v12 }
 0x208   :  { %v269_v15 = vsel %vm88_vm1, %v263_v14, 0  ;;  %1056 = vmatmul.mubr.msk.bf16.vlgmr.msra.gmra.mxu1 %vm264_vm8, %v76_v13 }
 0x209   :  { %1048 = vmatpush3.bf16.msra.mxu0 %v269_v15  ;;  %1067 = vmatprep.mubr.msk.bf16.mxu1 %vm402_vm9, %v1126_v30 }
 0x20c   :  { %1050 = vmatmul.mubr.msk.bf16.vlgmr.msra.gmra.mxu0 %vm264_vm8, %v176_v16 }
 0x2c8   :  { %v351_v17 = vpop.f32.mrf.mxu1 }
 0x2ca   :  { %v1057_v19 = vpop.f32.mrf.mxu1 }
 0x2cc   :  { %v305_v20 = vpop.f32.mrf.mxu0  ;;  %v354_v21 = vpop.f32.mrf.mxu1 }
 0x2cd   :  { %v352_v23 = vadd.f32 %v351_v17, %v305_v20 }
 0x2ce   :  { %v1051_v24 = vpop.f32.mrf.mxu0  ;;  %v1058_v25 = vpop.f32.mrf.mxu1 }
 0x2cf   :  { %v1315_v26 = vadd.f32 %v360_v22, %v352_v23 }
 0x2d0   :  { %v308_v27 = vpop.f32.mrf.mxu0 }
 0x2d1   :  { %365 = vrot.lane.b32.xlu0 %v1315_v26, %s1144_s6  ;;  %367 = vrot.lane.b32.xlu1 %v1315_v26, %s1145_s29  ;;  %v587_v55 = vpack.c.bf16 %v1315_v26, %v1315_v26 }
 0x2d2   :  { %v1052_v29 = vpop.f32.mrf.mxu0 }
 0x2d3   :  { %v599_v61 = vsel %vm140_vm7, %v587_v55, 0 }
 0x2d5   :  { %369 = vrot.lane.b32.xlu1 %v1315_v26, %s1146_s30  ;;  %400 = vrot.lane.b32.xlu0 %v1322_v28, %s1147_s18 }
 0x2d9   :  { %371 = vrot.lane.b32.xlu1 %v1315_v26, %s1148_s20  ;;  %523 = vrot.lane.b32.xlu0 %v1322_v28, %s1149_s21 }
 0x2dd   :  { %373 = vrot.lane.b32.xlu1 %v1315_v26, %s1150_s22  ;;  %590 = vrot.lane.b32.xlu0 %v1322_v28, %s1151_s2 }
 0x2e1   :  { %363 = vrot.lane.b32.xlu1 %v1315_v26, %s1152_s3  ;;  %658 = vrot.lane.b32.xlu0 %v1322_v28, %s1153_s0 }
 0x2e5   :  { %398 = vrot.lane.b32.xlu1 %v1126_v30, %s1147_s18  ;;  %727 = vrot.lane.b32.xlu0 %v1322_v28, %s1154_s14 }
 0x2e9   :  { %521 = vrot.lane.b32.xlu1 %v1126_v30, %s1149_s21  ;;  %797 = vrot.lane.b32.xlu0 %v1322_v28, %s1155_s8 }
 0x2ed   :  { %588 = vrot.lane.b32.xlu1 %v1126_v30, %s1151_s2 }
 0x2f1   :  { %656 = vrot.lane.b32.xlu1 %v1126_v30, %s1153_s0 }
 0x2f5   :  { %725 = vrot.lane.b32.xlu1 %v1126_v30, %s1154_s14 }
 0x2f9   :  { %795 = vrot.lane.b32.xlu1 %v1126_v30, %s1155_s8 }
 0x343   :  { %v368_v31 = vpop.permute.xlu1 %367  ;;  %v366_v38 = vpop.permute.xlu0 %365 }
 0x344   :  { %v722_v52 = vsel %vm379_vm13, %v1315_v26, %v368_v31 }
 0x347   :  { %v370_v32 = vpop.permute.xlu1 %369  ;;  %v401_v40 = vpop.permute.xlu0 %400 }
 0x348   :  { %v385_v33 = vsel %vm375_vm10, %v368_v31, %v370_v32  ;;  %v723_v56 = vsel %vm380_vm14, %v370_v32, %v722_v52 }
 0x349   :  { %v386_v34 = vsel %vm376_vm11, %v1315_v26, %v385_v33  ;;  %v724_v60 = vpack.c.bf16 %v723_v56, %v723_v56 }
 0x34a   :  { %v387_v35 = vpack.c.bf16 %v386_v34, %v386_v34 }
 0x34b   :  { %v372_v36 = vpop.permute.xlu1 %371  ;;  %v524_v49 = vpop.permute.xlu0 %523  ;;  %v736_v5 = vsel %vm140_vm7, %v724_v60, 0 }
 0x34c   :  { %1101 = vmatprep.subr.msk.bf16.mxu0 %vm140_vm7, %v387_v35  ;;  %v410_v37 = vsel %vm140_vm7, %v387_v35, 0 }
 0x34d   :  { %1060 = vmatpush3.bf16.msra.mxu0 %v410_v37 }
 0x34f   :  { %v374_v39 = vpop.permute.xlu1 %373  ;;  %v591_v62 = vpop.permute.xlu0 %590 }
 0x350   :  { %v381_v41 = vsel %vm375_vm10, %v372_v36, %v374_v39 }
 0x353   :  { %v364_v42 = vpop.permute.xlu1 %363  ;;  %v659_v3 = vpop.permute.xlu0 %658 }
 0x354   :  { %v382_v43 = vsel %vm376_vm11, %v364_v42, %v381_v41  ;;  %v519_v44 = vsel %vm375_vm10, %v364_v42, %v366_v38  ;;  %v654_v47 = vsel %vm380_vm14, %v366_v38, %v364_v42  ;;  %v791_v53 = vsel %vm378_vm15, %v364_v42, %v372_v36 }
 0x355   :  { %v520_v45 = vpack.c.bf16 %v519_v44, %v519_v44  ;;  %v383_v46 = vsel %vm377_vm12, %v366_v38, %v382_v43  ;;  %v655_v57 = vpack.c.bf16 %v654_v47, %v654_v47  ;;  %v792_v58 = vsel %vm379_vm13, %v366_v38, %v791_v53 }
 0x356   :  { %v384_v48 = vpack.c.bf16 %v383_v46, %v383_v46  ;;  %v793_v63 = vsel %vm380_vm14, %v374_v39, %v792_v58 }
 0x357   :  { %1103 = vmatprep.subr.msk.bf16.mxu0 %vm140_vm7, %v520_v45  ;;  %v399_v50 = vpop.permute.xlu1 %398  ;;  %v532_v51 = vsel %vm140_vm7, %v520_v45, 0  ;;  %v667_v1 = vsel %vm140_vm7, %v655_v57, 0  ;;  %v794_v2 = vpack.c.bf16 %v793_v63, %v793_v63  ;;  %v728_v7 = vpop.permute.xlu0 %727 }
 0x358   :  { %1061 = vmatprep.mubr.msk.bf16.mxu0 %vm402_vm9, %v399_v50  ;;  %1102 = vmatprep.subr.msk.bf16.mxu1 %vm140_vm7, %v384_v48  ;;  %v468_v54 = vsel %vm140_vm7, %v384_v48, 0 }
 0x359   :  { %1062 = vmatmul.mubr.msk.bf16.vlgmr.msra.gmra.mxu0 %vm402_vm9, %v401_v40  ;;  %1066 = vmatpush3.bf16.msra.mxu1 %v468_v54  ;;  %v806_v8 = vsel %vm140_vm7, %v794_v2, 0 }
 0x35a   :  { %1072 = vmatpush3.bf16.msra.mxu0 %v532_v51  ;;  %1104 = vmatprep.subr.msk.bf16.mxu1 %vm140_vm7, %v587_v55 }
 0x35b   :  { %1105 = vmatprep.subr.msk.bf16.mxu0 %vm140_vm7, %v655_v57  ;;  %v522_v59 = vpop.permute.xlu1 %521  ;;  %v798_v10 = vpop.permute.xlu0 %797 }
 0x35c   :  { %1068 = vmatmul.mubr.msk.bf16.vlgmr.msra.gmra.mxu1 %vm402_vm9, %v1322_v28  ;;  %1073 = vmatprep.mubr.msk.bf16.mxu0 %vm402_vm9, %v522_v59 }
 0x35d   :  { %1078 = vmatpush3.bf16.msra.mxu1 %v599_v61 }
 0x35e   :  { %1106 = vmatprep.subr.msk.bf16.mxu1 %vm140_vm7, %v724_v60 }
 0x35f   :  { %v589_v0 = vpop.permute.xlu1 %588 }
 0x360   :  { %1079 = vmatprep.mubr.msk.bf16.mxu1 %vm402_vm9, %v589_v0 }
 0x361   :  { %1074 = vmatmul.mubr.msk.bf16.vlgmr.msra.gmra.mxu0 %vm402_vm9, %v524_v49 }
 0x362   :  { %1084 = vmatpush3.bf16.msra.mxu0 %v667_v1 }
 0x363   :  { %1107 = vmatprep.subr.msk.bf16.mxu0 %vm140_vm7, %v794_v2  ;;  %v657_v4 = vpop.permute.xlu1 %656 }
 0x364   :  { %1080 = vmatmul.mubr.msk.bf16.vlgmr.msra.gmra.mxu1 %vm402_vm9, %v591_v62  ;;  %1085 = vmatprep.mubr.msk.bf16.mxu0 %vm402_vm9, %v657_v4 }
 0x365   :  { %1090 = vmatpush3.bf16.msra.mxu1 %v736_v5 }
 0x367   :  { %v726_v6 = vpop.permute.xlu1 %725 }
 0x368   :  { %1091 = vmatprep.mubr.msk.bf16.mxu1 %vm402_vm9, %v726_v6 }
 0x369   :  { %1086 = vmatmul.mubr.msk.bf16.vlgmr.msra.gmra.mxu0 %vm402_vm9, %v659_v3 }
 0x36a   :  { %1096 = vmatpush3.bf16.msra.mxu0 %v806_v8 }
 0x36b   :  { %v796_v9 = vpop.permute.xlu1 %795 }
 0x36c   :  { %1092 = vmatmul.mubr.msk.bf16.vlgmr.msra.gmra.mxu1 %vm402_vm9, %v728_v7  ;;  %1097 = vmatprep.mubr.msk.bf16.mxu0 %vm402_vm9, %v796_v9 }
 0x371   :  { %1098 = vmatmul.mubr.msk.bf16.vlgmr.msra.gmra.mxu0 %vm402_vm9, %v798_v10 }
 0x419   :  { %v1063_v11 = vpop.f32.mrf.mxu0 }
 0x41b   :  { %v446_v12 = vpop.f32.mrf.mxu0 }
 0x41c   :  { %v1069_v13 = vpop.f32.mrf.mxu1 }
 0x41d   :  { %v1064_v14 = vpop.f32.mrf.mxu0  ;;  %v513_v22 = vadd.f32 %v1069_v13, %v1063_v11 }
 0x41e   :  { %v504_v15 = vpop.f32.mrf.mxu1 }
 0x41f   :  { %v449_v16 = vpop.f32.mrf.mxu0  ;;  %v505_v25 = vadd.f32 %v504_v15, %v446_v12 }
 0x420   :  { %v1070_v17 = vpop.f32.mrf.mxu1 }
 0x421   :  { %v1075_v19 = vpop.f32.mrf.mxu0  ;;  %v516_v29 = vadd.f32 %v1070_v17, %v1064_v14 }
 0x422   :  { %v507_v20 = vpop.f32.mrf.mxu1  ;;  %v585_v26 = vadd.f32 %v1075_v19, %v513_v22 }
 0x423   :  { %v568_v21 = vpop.f32.mrf.mxu0  ;;  %v508_v33 = vadd.f32 %v507_v20, %v449_v16 }
 0x424   :  { %v1081_v23 = vpop.f32.mrf.mxu1  ;;  %v583_v30 = vadd.f32 %v568_v21, %v505_v25 }
 0x425   :  { %v1076_v24 = vpop.f32.mrf.mxu0  ;;  %v652_v34 = vadd.f32 %v1081_v23, %v585_v26 }
 0x426   :  { %v635_v27 = vpop.f32.mrf.mxu1  ;;  %v586_v35 = vadd.f32 %v1076_v24, %v516_v29 }
 0x427   :  { %v571_v28 = vpop.f32.mrf.mxu0  ;;  %v650_v38 = vadd.f32 %v635_v27, %v583_v30 }
 0x428   :  { %v1082_v31 = vpop.f32.mrf.mxu1  ;;  %v584_v39 = vadd.f32 %v571_v28, %v508_v33 }
 0x429   :  { %v1087_v32 = vpop.f32.mrf.mxu0  ;;  %v653_v43 = vadd.f32 %v1082_v31, %v586_v35 }
 0x42a   :  { %v638_v36 = vpop.f32.mrf.mxu1  ;;  %v720_v40 = vadd.f32 %v1087_v32, %v652_v34 }
 0x42b   :  { %v703_v37 = vpop.f32.mrf.mxu0  ;;  %v651_v47 = vadd.f32 %v638_v36, %v584_v39 }
 0x42c   :  { %v1093_v41 = vpop.f32.mrf.mxu1  ;;  %v718_v44 = vadd.f32 %v703_v37, %v650_v38 }
 0x42d   :  { %v1088_v42 = vpop.f32.mrf.mxu0  ;;  %v789_v48 = vadd.f32 %v1093_v41, %v720_v40  ;;  %v63_v40 = vld [vmem:[%s1471_s15] sm:$0xff] }
 0x42e   :  { %v772_v45 = vpop.f32.mrf.mxu1  ;;  %v721_v49 = vadd.f32 %v1088_v42, %v653_v43  ;;  %v64_v43 = vld [vmem:[%s1471_s15 + $0x8] sm:$0xff] }
 0x42f   :  { %v706_v46 = vpop.f32.mrf.mxu0  ;;  %v787_v52 = vadd.f32 %v772_v45, %v718_v44  ;;  %v65_v45 = vld [vmem:[%s1471_s15 + $0x10] sm:$0xff] }
 0x430   :  { %v1094_v50 = vpop.f32.mrf.mxu1  ;;  %v719_v53 = vadd.f32 %v706_v46, %v651_v47 }
 0x431   :  { %v1099_v51 = vpop.f32.mrf.mxu0  ;;  %v790_v57 = vadd.f32 %v1094_v50, %v721_v49 }
 0x432   :  { %v1396_v54 = vadd.f32 %v1099_v51, %v789_v48  ;;  %v775_v55 = vpop.f32.mrf.mxu1  ;;  %v66_v48 = vld [vmem:[%s1471_s15 + $0x18] sm:$0xff] }
 0x433   :  { %v842_v56 = vpop.f32.mrf.mxu0  ;;  %v788_v61 = vadd.f32 %v775_v55, %v719_v53  ;;  %v68_v53 = vld [vmem:[%s1472_s16 + $0x8] sm:$0xff] }
 0x434   :  { %v1398_v58 = vadd.f32 %v842_v56, %v787_v52  ;;  %v863_v59 = vsel %vm138_vm6, %v1396_v54, 0.0  ;;  %v67_v56 = vld [vmem:[%s1472_s16] sm:$0xff] }
 0x435   :  { %869 = vadd.xlane.f32.xlu0 %v863_v59  ;;  %v1100_v60 = vpop.f32.mrf.mxu0  ;;  %v875_v6 = vmul.f32 %v863_v59, %v863_v59 }
 0x436   :  { %v1403_v62 = vadd.f32 %v1100_v60, %v790_v57  ;;  %v861_v63 = vsel %vm138_vm6, %v1398_v58, 0.0  ;;  %v70_v60 = vld [vmem:[%s1472_s16 + $0x18] sm:$0xff] }
 0x437   :  { %865 = vadd.xlane.f32.xlu1 %v861_v63  ;;  %v845_v0 = vpop.f32.mrf.mxu0  ;;  %v873_v1 = vmul.f32 %v861_v63, %v861_v63 }
 0x438   :  { %v1408_v2 = vadd.f32 %v845_v0, %v788_v61  ;;  %v864_v3 = vsel %vm138_vm6, %v1403_v62, 0.0  ;;  %v69_v0 = vld [vmem:[%s1472_s16 + $0x10] sm:$0xff] }
 0x439   :  { %877 = vadd.xlane.f32.xlu0 %v873_v1  ;;  %v876_v7 = vmul.f32 %v864_v3, %v864_v3 }
 0x43a   :  { %v862_v4 = vsel %vm138_vm6, %v1408_v2, 0.0 }
 0x43b   :  { %871 = vadd.xlane.f32.xlu1 %v864_v3  ;;  %v874_v5 = vmul.f32 %v862_v4, %v862_v4 }
 0x43d   :  { %867 = vadd.xlane.f32.xlu0 %v862_v4 }
 0x43f   :  { %879 = vadd.xlane.f32.xlu1 %v874_v5 }
 0x441   :  { %881 = vadd.xlane.f32.xlu0 %v875_v6 }
 0x443   :  { %883 = vadd.xlane.f32.xlu1 %v876_v7 }
 0x4be   :  { %v870_v8 = vpop.xlane.xlu0 %869 }
 0x4bf   :  { %v887_v17 = vmul.f32 0.03125, %v870_v8 }
 0x4c0   :  { %v866_v9 = vpop.xlane.xlu1 %865 }
 0x4c1   :  { %v885_v10 = vmul.f32 0.03125, %v866_v9  ;;  %v895_v26 = vmul.f32 %v887_v17, %v887_v17 }
 0x4c2   :  { %v878_v11 = vpop.xlane.xlu0 %877 }
 0x4c3   :  { %v893_v12 = vmul.f32 %v885_v10, %v885_v10  ;;  %v889_v13 = vmul.f32 0.03125, %v878_v11 }
 0x4c4   :  { %v872_v14 = vpop.xlane.xlu1 %871 }
 0x4c5   :  { %v897_v15 = vsub.f32 %v889_v13, %v893_v12  ;;  %v888_v22 = vmul.f32 0.03125, %v872_v14 }
 0x4c6   :  { %v868_v16 = vpop.xlane.xlu0 %867 }
 0x4c7   :  { %v901_v18 = vmax.f32 %v897_v15, 0.0  ;;  %v886_v19 = vmul.f32 0.03125, %v868_v16  ;;  %v896_v30 = vmul.f32 %v888_v22, %v888_v22 }
 0x4c8   :  { %v880_v20 = vpop.xlane.xlu1 %879 }
 0x4c9   :  { %v905_v21 = vadd.f32 1e-05, %v901_v18  ;;  %v894_v23 = vmul.f32 %v886_v19, %v886_v19  ;;  %v890_v24 = vmul.f32 0.03125, %v880_v20 }
 0x4ca   :  { %v882_v25 = vpop.xlane.xlu0 %881 }
 0x4cb   :  { %1132 = vrsqrt.f32 %v905_v21  ;;  %v898_v27 = vsub.f32 %v890_v24, %v894_v23  ;;  %v891_v28 = vmul.f32 0.03125, %v882_v25 }
 0x4cc   :  { %v884_v29 = vpop.xlane.xlu1 %883 }
 0x4cd   :  { %v902_v31 = vmax.f32 %v898_v27, 0.0  ;;  %v899_v32 = vsub.f32 %v891_v28, %v895_v26  ;;  %v892_v33 = vmul.f32 0.03125, %v884_v29 }
 0x4cf   :  { %v906_v34 = vadd.f32 1e-05, %v902_v31  ;;  %v903_v35 = vmax.f32 %v899_v32, 0.0  ;;  %v900_v36 = vsub.f32 %v892_v33, %v896_v30 }
 0x4d1   :  { %1134 = vrsqrt.f32 %v906_v34  ;;  %v907_v37 = vadd.f32 1e-05, %v903_v35  ;;  %v904_v38 = vmax.f32 %v900_v36, 0.0 }
 0x4d3   :  { %1136 = vrsqrt.f32 %v907_v37  ;;  %v908_v39 = vadd.f32 1e-05, %v904_v38 }
 0x4d5   :  { %1138 = vrsqrt.f32 %v908_v39 }
 0x4d8   :  { %v1133_v41 = vpop.eup %1132 }
 0x4d9   :  { %v913_v42 = vmul.f32 %v1133_v41, %v63_v40 }
 0x4db   :  { %919 = vperm.xlu0 %1124, %v913_v42   ;;  %v941_v55 = vmul.f32 %v913_v42, %v885_v10 }
 0x4dd   :  { %v945_v61 = vsub.f32 %v67_v56, %v941_v55 }
 0x4de   :  { %v1135_v44 = vpop.eup %1134 }
 0x4df   :  { %v914_v46 = vmul.f32 %v1135_v44, %v64_v43 }
 0x4e0   :  { %v1137_v47 = vpop.eup %1136 }
 0x4e1   :  { %v915_v49 = vmul.f32 %v1137_v47, %v65_v45  ;;  %v942_v52 = vmul.f32 %v914_v46, %v886_v19 }
 0x4e2   :  { %v1139_v50 = vpop.eup %1138 }
 0x4e3   :  { %929 = vperm.xlu1 %1125, %v915_v49   ;;  %v916_v51 = vmul.f32 %v1139_v50, %v66_v48  ;;  %v946_v57 = vsub.f32 %v68_v53, %v942_v52  ;;  %v943_v63 = vmul.f32 %v915_v49, %v887_v17 }
 0x4e5   :  { %934 = vperm.xlu0 %1124, %v916_v51   ;;  %v944_v59 = vmul.f32 %v916_v51, %v888_v22  ;;  %v947_v3 = vsub.f32 %v69_v0, %v943_v63 }
 0x4e7   :  { %924 = vperm.xlu1 %1125, %v914_v46   ;;  %v948_v1 = vsub.f32 %v70_v60, %v944_v59 }
 0x4e9   :  { %956 = vperm.xlu0 %1124, %v946_v57  }
 0x4eb   :  { %951 = vperm.xlu1 %1125, %v945_v61  }
 0x4ed   :  { %966 = vperm.xlu0 %1124, %v948_v1  }
 0x4ef   :  { %961 = vperm.xlu1 %1125, %v947_v3  }
 0x556   :  { %v920_v4 = vpop.permute.xlu0 %919 }
 0x557   :  { %v937_v10 = vmul.f32 %v920_v4, %v1398_v58 }
 0x55e   :  { %v930_v5 = vpop.permute.xlu1 %929 }
 0x55f   :  { %v939_v17 = vmul.f32 %v930_v5, %v1396_v54 }
 0x560   :  { %v935_v6 = vpop.permute.xlu0 %934 }
 0x561   :  { %v940_v13 = vmul.f32 %v935_v6, %v1403_v62 }
 0x562   :  { %v925_v7 = vpop.permute.xlu1 %924 }
 0x563   :  { %v938_v8 = vmul.f32 %v925_v7, %v1408_v2 }
 0x564   :  { %v957_v9 = vpop.permute.xlu0 %956 }
 0x565   :  { %v970_v11 = vadd.f32 %v957_v9, %v938_v8 }
 0x566   :  { %v952_v12 = vpop.permute.xlu1 %951 }
 0x567   :  { %v974_v14 = vmax.f32 %v970_v11, 0.0  ;;  %v969_v15 = vadd.f32 %v952_v12, %v937_v10 }
 0x568   :  { %v967_v16 = vpop.permute.xlu0 %966 }
 0x569   :  { %978 = vst [vmem:[%s1473_s17 + $0x8] sm:$0xff] %v974_v14  ;;  %v973_v18 = vmax.f32 %v969_v15, 0.0  ;;  %v972_v19 = vadd.f32 %v967_v16, %v940_v13 }
 0x56a   :  { %v962_v20 = vpop.permute.xlu1 %961 }
 0x56b   :  { %977 = vst [vmem:[%s1473_s17] sm:$0xff] %v973_v18  ;;  %v976_v58 = vmax.f32 %v972_v19, 0.0  ;;  %v971_v2 = vadd.f32 %v962_v20, %v939_v17 }
 0x56d   :  { %980 = vst [vmem:[%s1473_s17 + $0x18] sm:$0xff] %v976_v58  ;;  %v975_v62 = vmax.f32 %v971_v2, 0.0 }
 0x56f   :  { %979 = vst [vmem:[%s1473_s17 + $0x10] sm:$0xff] %v975_v62 }

</bundles_post_ra>
